<compile_context>
chip_gen: v6e
topology: v6e:2x2x1
jax: 0.10.0
libtpu: 0.0.40
codegen_flags: <defaults>
</compile_context>

<pallas_src>
import functools

import jax
import jax.numpy as jnp
from jax.experimental import pallas as pl
from jax.experimental.pallas import tpu as pltpu

# True (unpadded) layer dimensions: mlp_1..mlp_8, fc_g1, fc1, fc2, out
LAYER_DIMS = [78, 78, 156, 312, 156, 78, 78, 156, 156, 128, 1024, 512, 1]
NUM_LAYERS = len(LAYER_DIMS) - 1          # 12 linear layers
NUM_MM_LAYERS = NUM_LAYERS - 1            # 11 matmul layers; the head is a reduction
NUM_LEAKY = 9                             # mlp_1..mlp_8 + fc_g1 -> leaky_relu
NUM_RELU = 2                              # fc1, fc2 -> relu
LEAKY_SLOPE = 0.01


def _round_up(n, m):
    return ((n + m - 1) // m) * m


PADDED_DIMS = [_round_up(d, 128) for d in LAYER_DIMS]

# ---- static bookkeeping: group matmul weights by padded output width ----------
GROUP_WIDTHS = sorted({PADDED_DIMS[i + 1] for i in range(NUM_MM_LAYERS)})
GROUP_LAYERS = {
    w: [i for i in range(NUM_MM_LAYERS) if PADDED_DIMS[i + 1] == w]
    for w in GROUP_WIDTHS
}
# layer index -> (slab index, row offset in slab, padded in-dim, padded out-dim)
LAYER_SLAB = {}
for _g_idx, _w in enumerate(GROUP_WIDTHS):
    _off = 0
    for _i in GROUP_LAYERS[_w]:
        LAYER_SLAB[_i] = (_g_idx, _off, PADDED_DIMS[_i], _w)
        _off += PADDED_DIMS[_i]

# bias / head-weight stack layout (f32):
#   rows 0..11  : bias of layer i in cols [0, out_dim)
#   row  12     : output-head weight vector (512 values) in cols [0, 512)
BIAS_ROWS = 16
BIAS_COLS = max(PADDED_DIMS[1:])          # 1024
HEAD_W_ROW = NUM_LAYERS                   # 12
HEAD_IN = LAYER_DIMS[-2]                  # 512 (also PADDED_DIMS[-2])


def _pad2d(a, rows, cols):
    return jnp.pad(a, ((0, rows - a.shape[0]), (0, cols - a.shape[1])))


def _batch_tiling(batch):
    """(padded_batch, batch_tile): pad to a multiple of the tile, tile <= 128."""
    b8 = _round_up(batch, 8)
    if b8 <= 128:
        return b8, b8
    return _round_up(batch, 128), 128


# ------------------------------- kernel ---------------------------------------
def mlp_fused_kernel(x_ref, *refs):
    """Fused forward pass: 11 bf16 matmul layers + vector-reduction head."""
    out_ref = refs[-1]
    bias_ref = refs[-2]
    w_refs = refs[:-2]                    # one bf16 slab per GROUP_WIDTHS entry

    h = x_ref[...]                        # (bt, 128) f32

    for i in range(NUM_MM_LAYERS):
        g_idx, off, in_pad, out_pad = LAYER_SLAB[i]
        w = w_refs[g_idx][off:off + in_pad, :]          # static, tile-aligned slice (bf16)
        b = bias_ref[i:i + 1, :out_pad]                 # (1, out_pad) f32
        h = jnp.dot(h.astype(jnp.bfloat16), w,
                    preferred_element_type=jnp.float32) + b
        if i < NUM_LEAKY:
            h = jnp.maximum(h, LEAKY_SLOPE * h)         # leaky_relu
        else:
            h = jnp.maximum(h, 0.0)                     # relu

    # output head: (bt, 512) . (512,) + b  as a lane reduction (no padded matmul)
    head_w = bias_ref[HEAD_W_ROW:HEAD_W_ROW + 1, :HEAD_IN]      # (1, 512) f32
    head_b = bias_ref[NUM_LAYERS - 1:NUM_LAYERS, 0:1]           # (1, 1)   f32
    out_ref[...] = jnp.sum(h * head_w, axis=-1, keepdims=True) + head_b


# ------------------------------ parameters ------------------------------------
def init_params(key):
    """Deterministic synthetic parameters (PyTorch Linear shapes, transposed)."""
    weights, biases = [], []
    for i in range(NUM_LAYERS):
        d_in, d_out = LAYER_DIMS[i], LAYER_DIMS[i + 1]
        key, kw, kb = jax.random.split(key, 3)
        bound = 1.0 / jnp.sqrt(d_in)
        weights.append(jax.random.uniform(kw, (d_in, d_out), jnp.float32, -bound, bound))
        biases.append(jax.random.uniform(kb, (1, d_out), jnp.float32, -bound, bound))
    return weights, biases


def prepare_params(weights, biases):
    """One-time packing: bf16 weight slabs (grouped by output width) + f32 bias stack."""
    slabs = []
    for w_width in GROUP_WIDTHS:
        parts = [
            _pad2d(weights[i].astype(jnp.float32), PADDED_DIMS[i], w_width)
            .astype(jnp.bfloat16)
            for i in GROUP_LAYERS[w_width]
        ]
        slabs.append(jnp.concatenate(parts, axis=0))

    bias_stack = jnp.zeros((BIAS_ROWS, BIAS_COLS), jnp.float32)
    for i in range(NUM_LAYERS):
        bias_stack = bias_stack.at[i, :LAYER_DIMS[i + 1]].set(biases[i][0])
    bias_stack = bias_stack.at[HEAD_W_ROW, :HEAD_IN].set(weights[-1][:, 0])
    return tuple(slabs), bias_stack


# ------------------------------- forward --------------------------------------
@functools.partial(jax.jit, static_argnames=("batch",))
def mlpnet_forward(x, slabs, bias_stack, batch):
    """x: (batch, 78) float32 -> (batch, 1) float32."""
    padded_batch, bt = _batch_tiling(batch)
    xp = jnp.pad(
        x.astype(jnp.float32),
        ((0, padded_batch - batch), (0, PADDED_DIMS[0] - x.shape[1])),
    )

    grid = (padded_batch // bt,)
    in_specs = [pl.BlockSpec((bt, PADDED_DIMS[0]), lambda i: (i, 0))]
    for slab in slabs:
        in_specs.append(pl.BlockSpec(slab.shape, lambda i: (0, 0)))
    in_specs.append(pl.BlockSpec(bias_stack.shape, lambda i: (0, 0)))

    out_padded = pl.pallas_call(
        mlp_fused_kernel,
        out_shape=jax.ShapeDtypeStruct((padded_batch, 1), jnp.float32),
        grid=grid,
        in_specs=in_specs,
        out_specs=pl.BlockSpec((bt, 1), lambda i: (i, 0)),
        compiler_params=pltpu.CompilerParams(dimension_semantics=("parallel",)),
    )(xp, *slabs, bias_stack)

    return out_padded[:batch, :]


# ------------------------------ reference -------------------------------------
def reference_forward(x, weights, biases):
    """Pure-JAX reference mirroring the kernel's bf16-weight / f32-accumulate math."""
    h = x.astype(jnp.float32)
    for i in range(NUM_LEAKY):
        h = jnp.dot(h.astype(jnp.bfloat16), weights[i].astype(jnp.bfloat16),
                    preferred_element_type=jnp.float32) + biases[i]
        h = jnp.maximum(h, LEAKY_SLOPE * h)
    for i in range(NUM_LEAKY, NUM_LEAKY + NUM_RELU):
        h = jnp.dot(h.astype(jnp.bfloat16), weights[i].astype(jnp.bfloat16),
                    preferred_element_type=jnp.float32) + biases[i]
        h = jnp.maximum(h, 0.0)
    return jnp.dot(h, weights[-1]) + biases[-1]


if __name__ == "__main__":
    key = jax.random.PRNGKey(0)
    kx, kt, kl, kp = jax.random.split(key, 4)

    batch = 2
    num_features_xd = 78
    num_features_xt = 25

    # data = (x, target, label); target/label unused in the 'no_protein' path.
    x = jax.random.normal(kx, (batch, num_features_xd), jnp.float32)
    target = jax.random.randint(kt, (batch, num_features_xt), 0, num_features_xt + 1)
    label = jax.random.normal(kl, (batch,), jnp.float32)
    del target, label  # not consumed by the forward pass in this configuration

    weights, biases = init_params(kp)
    slabs, bias_stack = prepare_params(weights, biases)   # one-time packing

    out = mlpnet_forward(x, slabs, bias_stack, batch)
    out = jax.block_until_ready(out)

    ref = reference_forward(x, weights, biases)
    assert out.shape == (batch, 1), out.shape
    assert jnp.allclose(out, ref, atol=2e-3, rtol=2e-3), (out, ref)

    print("KERNEL_OK")
</pallas_src>

<mosaic_0001>
module attributes {stable_mosaic.version = 11 : i64} {
  func.func @mlp_fused_kernel(%arg0: i32, %arg1: memref<8x128xf32, #tpu.memory_space<vmem>>, %arg2: memref<768x128xbf16, #tpu.memory_space<vmem>>, %arg3: memref<896x256xbf16, #tpu.memory_space<vmem>>, %arg4: memref<256x384xbf16, #tpu.memory_space<vmem>>, %arg5: memref<1024x512xbf16, #tpu.memory_space<vmem>>, %arg6: memref<128x1024xbf16, #tpu.memory_space<vmem>>, %arg7: memref<16x1024xf32, #tpu.memory_space<vmem>>, %arg8: memref<8x1xf32, #tpu.memory_space<vmem>>) attributes {dimension_semantics = [#tpu.dimension_semantics<parallel>], iteration_bounds = array<i64: 1>, scalar_prefetch = 0 : i64, scratch_operands = 0 : i64, tpu.core_type = #tpu.core_type<tc>, window_params = [{transform_indices = @transform_0, window_bounds = array<i64: 8, 128>}, {pipeline_mode = #tpu.pipeline_mode<synchronous>, transform_indices = @transform_1, window_bounds = array<i64: 768, 128>}, {pipeline_mode = #tpu.pipeline_mode<synchronous>, transform_indices = @transform_2, window_bounds = array<i64: 896, 256>}, {pipeline_mode = #tpu.pipeline_mode<synchronous>, transform_indices = @transform_3, window_bounds = array<i64: 256, 384>}, {pipeline_mode = #tpu.pipeline_mode<synchronous>, transform_indices = @transform_4, window_bounds = array<i64: 1024, 512>}, {pipeline_mode = #tpu.pipeline_mode<synchronous>, transform_indices = @transform_5, window_bounds = array<i64: 128, 1024>}, {pipeline_mode = #tpu.pipeline_mode<synchronous>, transform_indices = @transform_6, window_bounds = array<i64: 16, 1024>}, {transform_indices = @transform_7, window_bounds = array<i64: 8, 1>}]} {
    %c0 = arith.constant 0 : index
    %c0_0 = arith.constant 0 : index
    %0 = vector.load %arg1[%c0, %c0_0] : memref<8x128xf32, #tpu.memory_space<vmem>>, vector<8x128xf32>
    %c0_1 = arith.constant 0 : index
    %c0_2 = arith.constant 0 : index
    %1 = vector.load %arg2[%c0_1, %c0_2] : memref<768x128xbf16, #tpu.memory_space<vmem>>, vector<128x128xbf16>
    %c0_3 = arith.constant 0 : index
    %c0_4 = arith.constant 0 : index
    %2 = vector.load %arg7[%c0_3, %c0_4] : memref<16x1024xf32, #tpu.memory_space<vmem>>, vector<1x128xf32>
    %3 = arith.truncf %0 : vector<8x128xf32> to vector<8x128xbf16>
    %cst = arith.constant dense<0.000000e+00> : vector<8x128xf32>
    %4 = tpu.matmul %3, %1, %cst {dimension_numbers = #tpu.dot_dimension_numbers<[1], [0], [0], [1], [0, 0, 1, 1], [], []>} : vector<8x128xbf16>, vector<128x128xbf16>, vector<8x128xf32> -> vector<8x128xf32>
    %5 = vector.broadcast %2 : vector<1x128xf32> to vector<8x128xf32>
    %6 = arith.addf %4, %5 : vector<8x128xf32>
    %cst_5 = arith.constant 0.00999999977 : f32
    %7 = vector.broadcast %cst_5 : f32 to vector<8x128xf32>
    %8 = arith.mulf %7, %6 : vector<8x128xf32>
    %9 = arith.maximumf %6, %8 : vector<8x128xf32>
    %c0_6 = arith.constant 0 : index
    %c0_7 = arith.constant 0 : index
    %10 = vector.load %arg3[%c0_6, %c0_7] : memref<896x256xbf16, #tpu.memory_space<vmem>>, vector<128x256xbf16>
    %c1 = arith.constant 1 : index
    %c0_8 = arith.constant 0 : index
    %11 = vector.load %arg7[%c1, %c0_8] : memref<16x1024xf32, #tpu.memory_space<vmem>>, vector<1x256xf32>
    %12 = arith.truncf %9 : vector<8x128xf32> to vector<8x128xbf16>
    %cst_9 = arith.constant dense<0.000000e+00> : vector<8x256xf32>
    %13 = tpu.matmul %12, %10, %cst_9 {dimension_numbers = #tpu.dot_dimension_numbers<[1], [0], [0], [1], [0, 0, 1, 1], [], []>} : vector<8x128xbf16>, vector<128x256xbf16>, vector<8x256xf32> -> vector<8x256xf32>
    %14 = vector.broadcast %11 : vector<1x256xf32> to vector<8x256xf32>
    %15 = arith.addf %13, %14 : vector<8x256xf32>
    %cst_10 = arith.constant 0.00999999977 : f32
    %16 = vector.broadcast %cst_10 : f32 to vector<8x256xf32>
    %17 = arith.mulf %16, %15 : vector<8x256xf32>
    %18 = arith.maximumf %15, %17 : vector<8x256xf32>
    %c0_11 = arith.constant 0 : index
    %c0_12 = arith.constant 0 : index
    %19 = vector.load %arg4[%c0_11, %c0_12] : memref<256x384xbf16, #tpu.memory_space<vmem>>, vector<256x384xbf16>
    %c2 = arith.constant 2 : index
    %c0_13 = arith.constant 0 : index
    %20 = vector.load %arg7[%c2, %c0_13] : memref<16x1024xf32, #tpu.memory_space<vmem>>, vector<1x384xf32>
    %21 = arith.truncf %18 : vector<8x256xf32> to vector<8x256xbf16>
    %cst_14 = arith.constant dense<0.000000e+00> : vector<8x384xf32>
    %22 = tpu.matmul %21, %19, %cst_14 {dimension_numbers = #tpu.dot_dimension_numbers<[1], [0], [0], [1], [0, 0, 1, 1], [], []>} : vector<8x256xbf16>, vector<256x384xbf16>, vector<8x384xf32> -> vector<8x384xf32>
    %23 = vector.broadcast %20 : vector<1x384xf32> to vector<8x384xf32>
    %24 = arith.addf %22, %23 : vector<8x384xf32>
    %cst_15 = arith.constant 0.00999999977 : f32
    %25 = vector.broadcast %cst_15 : f32 to vector<8x384xf32>
    %26 = arith.mulf %25, %24 : vector<8x384xf32>
    %27 = arith.maximumf %24, %26 : vector<8x384xf32>
    %c128 = arith.constant 128 : index
    %c0_16 = arith.constant 0 : index
    %28 = vector.load %arg3[%c128, %c0_16] : memref<896x256xbf16, #tpu.memory_space<vmem>>, vector<384x256xbf16>
    %c3 = arith.constant 3 : index
    %c0_17 = arith.constant 0 : index
    %29 = vector.load %arg7[%c3, %c0_17] : memref<16x1024xf32, #tpu.memory_space<vmem>>, vector<1x256xf32>
    %30 = arith.truncf %27 : vector<8x384xf32> to vector<8x384xbf16>
    %cst_18 = arith.constant dense<0.000000e+00> : vector<8x256xf32>
    %31 = tpu.matmul %30, %28, %cst_18 {dimension_numbers = #tpu.dot_dimension_numbers<[1], [0], [0], [1], [0, 0, 1, 1], [], []>} : vector<8x384xbf16>, vector<384x256xbf16>, vector<8x256xf32> -> vector<8x256xf32>
    %32 = vector.broadcast %29 : vector<1x256xf32> to vector<8x256xf32>
    %33 = arith.addf %31, %32 : vector<8x256xf32>
    %cst_19 = arith.constant 0.00999999977 : f32
    %34 = vector.broadcast %cst_19 : f32 to vector<8x256xf32>
    %35 = arith.mulf %34, %33 : vector<8x256xf32>
    %36 = arith.maximumf %33, %35 : vector<8x256xf32>
    %c128_20 = arith.constant 128 : index
    %c0_21 = arith.constant 0 : index
    %37 = vector.load %arg2[%c128_20, %c0_21] : memref<768x128xbf16, #tpu.memory_space<vmem>>, vector<256x128xbf16>
    %c4 = arith.constant 4 : index
    %c0_22 = arith.constant 0 : index
    %38 = vector.load %arg7[%c4, %c0_22] : memref<16x1024xf32, #tpu.memory_space<vmem>>, vector<1x128xf32>
    %39 = arith.truncf %36 : vector<8x256xf32> to vector<8x256xbf16>
    %cst_23 = arith.constant dense<0.000000e+00> : vector<8x128xf32>
    %40 = tpu.matmul %39, %37, %cst_23 {dimension_numbers = #tpu.dot_dimension_numbers<[1], [0], [0], [1], [0, 0, 1, 1], [], []>} : vector<8x256xbf16>, vector<256x128xbf16>, vector<8x128xf32> -> vector<8x128xf32>
    %41 = vector.broadcast %38 : vector<1x128xf32> to vector<8x128xf32>
    %42 = arith.addf %40, %41 : vector<8x128xf32>
    %cst_24 = arith.constant 0.00999999977 : f32
    %43 = vector.broadcast %cst_24 : f32 to vector<8x128xf32>
    %44 = arith.mulf %43, %42 : vector<8x128xf32>
    %45 = arith.maximumf %42, %44 : vector<8x128xf32>
    %c384 = arith.constant 384 : index
    %c0_25 = arith.constant 0 : index
    %46 = vector.load %arg2[%c384, %c0_25] : memref<768x128xbf16, #tpu.memory_space<vmem>>, vector<128x128xbf16>
    %c5 = arith.constant 5 : index
    %c0_26 = arith.constant 0 : index
    %47 = vector.load %arg7[%c5, %c0_26] : memref<16x1024xf32, #tpu.memory_space<vmem>>, vector<1x128xf32>
    %48 = arith.truncf %45 : vector<8x128xf32> to vector<8x128xbf16>
    %cst_27 = arith.constant dense<0.000000e+00> : vector<8x128xf32>
    %49 = tpu.matmul %48, %46, %cst_27 {dimension_numbers = #tpu.dot_dimension_numbers<[1], [0], [0], [1], [0, 0, 1, 1], [], []>} : vector<8x128xbf16>, vector<128x128xbf16>, vector<8x128xf32> -> vector<8x128xf32>
    %50 = vector.broadcast %47 : vector<1x128xf32> to vector<8x128xf32>
    %51 = arith.addf %49, %50 : vector<8x128xf32>
    %cst_28 = arith.constant 0.00999999977 : f32
    %52 = vector.broadcast %cst_28 : f32 to vector<8x128xf32>
    %53 = arith.mulf %52, %51 : vector<8x128xf32>
    %54 = arith.maximumf %51, %53 : vector<8x128xf32>
    %c512 = arith.constant 512 : index
    %c0_29 = arith.constant 0 : index
    %55 = vector.load %arg3[%c512, %c0_29] : memref<896x256xbf16, #tpu.memory_space<vmem>>, vector<128x256xbf16>
    %c6 = arith.constant 6 : index
    %c0_30 = arith.constant 0 : index
    %56 = vector.load %arg7[%c6, %c0_30] : memref<16x1024xf32, #tpu.memory_space<vmem>>, vector<1x256xf32>
    %57 = arith.truncf %54 : vector<8x128xf32> to vector<8x128xbf16>
    %cst_31 = arith.constant dense<0.000000e+00> : vector<8x256xf32>
    %58 = tpu.matmul %57, %55, %cst_31 {dimension_numbers = #tpu.dot_dimension_numbers<[1], [0], [0], [1], [0, 0, 1, 1], [], []>} : vector<8x128xbf16>, vector<128x256xbf16>, vector<8x256xf32> -> vector<8x256xf32>
    %59 = vector.broadcast %56 : vector<1x256xf32> to vector<8x256xf32>
    %60 = arith.addf %58, %59 : vector<8x256xf32>
    %cst_32 = arith.constant 0.00999999977 : f32
    %61 = vector.broadcast %cst_32 : f32 to vector<8x256xf32>
    %62 = arith.mulf %61, %60 : vector<8x256xf32>
    %63 = arith.maximumf %60, %62 : vector<8x256xf32>
    %c640 = arith.constant 640 : index
    %c0_33 = arith.constant 0 : index
    %64 = vector.load %arg3[%c640, %c0_33] : memref<896x256xbf16, #tpu.memory_space<vmem>>, vector<256x256xbf16>
    %c7 = arith.constant 7 : index
    %c0_34 = arith.constant 0 : index
    %65 = vector.load %arg7[%c7, %c0_34] : memref<16x1024xf32, #tpu.memory_space<vmem>>, vector<1x256xf32>
    %66 = arith.truncf %63 : vector<8x256xf32> to vector<8x256xbf16>
    %cst_35 = arith.constant dense<0.000000e+00> : vector<8x256xf32>
    %67 = tpu.matmul %66, %64, %cst_35 {dimension_numbers = #tpu.dot_dimension_numbers<[1], [0], [0], [1], [0, 0, 1, 1], [], []>} : vector<8x256xbf16>, vector<256x256xbf16>, vector<8x256xf32> -> vector<8x256xf32>
    %68 = vector.broadcast %65 : vector<1x256xf32> to vector<8x256xf32>
    %69 = arith.addf %67, %68 : vector<8x256xf32>
    %cst_36 = arith.constant 0.00999999977 : f32
    %70 = vector.broadcast %cst_36 : f32 to vector<8x256xf32>
    %71 = arith.mulf %70, %69 : vector<8x256xf32>
    %72 = arith.maximumf %69, %71 : vector<8x256xf32>
    %c512_37 = arith.constant 512 : index
    %c0_38 = arith.constant 0 : index
    %73 = vector.load %arg2[%c512_37, %c0_38] : memref<768x128xbf16, #tpu.memory_space<vmem>>, vector<256x128xbf16>
    %c8 = arith.constant 8 : index
    %c0_39 = arith.constant 0 : index
    %74 = vector.load %arg7[%c8, %c0_39] : memref<16x1024xf32, #tpu.memory_space<vmem>>, vector<1x128xf32>
    %75 = arith.truncf %72 : vector<8x256xf32> to vector<8x256xbf16>
    %cst_40 = arith.constant dense<0.000000e+00> : vector<8x128xf32>
    %76 = tpu.matmul %75, %73, %cst_40 {dimension_numbers = #tpu.dot_dimension_numbers<[1], [0], [0], [1], [0, 0, 1, 1], [], []>} : vector<8x256xbf16>, vector<256x128xbf16>, vector<8x128xf32> -> vector<8x128xf32>
    %77 = vector.broadcast %74 : vector<1x128xf32> to vector<8x128xf32>
    %78 = arith.addf %76, %77 : vector<8x128xf32>
    %cst_41 = arith.constant 0.00999999977 : f32
    %79 = vector.broadcast %cst_41 : f32 to vector<8x128xf32>
    %80 = arith.mulf %79, %78 : vector<8x128xf32>
    %81 = arith.maximumf %78, %80 : vector<8x128xf32>
    %c0_42 = arith.constant 0 : index
    %c0_43 = arith.constant 0 : index
    %82 = vector.load %arg6[%c0_42, %c0_43] : memref<128x1024xbf16, #tpu.memory_space<vmem>>, vector<128x1024xbf16>
    %c9 = arith.constant 9 : index
    %c0_44 = arith.constant 0 : index
    %83 = vector.load %arg7[%c9, %c0_44] : memref<16x1024xf32, #tpu.memory_space<vmem>>, vector<1x1024xf32>
    %84 = arith.truncf %81 : vector<8x128xf32> to vector<8x128xbf16>
    %cst_45 = arith.constant dense<0.000000e+00> : vector<8x1024xf32>
    %85 = tpu.matmul %84, %82, %cst_45 {dimension_numbers = #tpu.dot_dimension_numbers<[1], [0], [0], [1], [0, 0, 1, 1], [], []>} : vector<8x128xbf16>, vector<128x1024xbf16>, vector<8x1024xf32> -> vector<8x1024xf32>
    %86 = vector.broadcast %83 : vector<1x1024xf32> to vector<8x1024xf32>
    %87 = arith.addf %85, %86 : vector<8x1024xf32>
    %cst_46 = arith.constant 0.000000e+00 : f32
    %88 = vector.broadcast %cst_46 : f32 to vector<8x1024xf32>
    %89 = arith.maximumf %87, %88 : vector<8x1024xf32>
    %c0_47 = arith.constant 0 : index
    %c0_48 = arith.constant 0 : index
    %90 = vector.load %arg5[%c0_47, %c0_48] : memref<1024x512xbf16, #tpu.memory_space<vmem>>, vector<1024x512xbf16>
    %c10 = arith.constant 10 : index
    %c0_49 = arith.constant 0 : index
    %91 = vector.load %arg7[%c10, %c0_49] : memref<16x1024xf32, #tpu.memory_space<vmem>>, vector<1x512xf32>
    %92 = arith.truncf %89 : vector<8x1024xf32> to vector<8x1024xbf16>
    %cst_50 = arith.constant dense<0.000000e+00> : vector<8x512xf32>
    %93 = tpu.matmul %92, %90, %cst_50 {dimension_numbers = #tpu.dot_dimension_numbers<[1], [0], [0], [1], [0, 0, 1, 1], [], []>} : vector<8x1024xbf16>, vector<1024x512xbf16>, vector<8x512xf32> -> vector<8x512xf32>
    %94 = vector.broadcast %91 : vector<1x512xf32> to vector<8x512xf32>
    %95 = arith.addf %93, %94 : vector<8x512xf32>
    %cst_51 = arith.constant 0.000000e+00 : f32
    %96 = vector.broadcast %cst_51 : f32 to vector<8x512xf32>
    %97 = arith.maximumf %95, %96 : vector<8x512xf32>
    %c12 = arith.constant 12 : index
    %c0_52 = arith.constant 0 : index
    %98 = vector.load %arg7[%c12, %c0_52] : memref<16x1024xf32, #tpu.memory_space<vmem>>, vector<1x512xf32>
    %c11 = arith.constant 11 : index
    %c0_53 = arith.constant 0 : index
    %99 = vector.load %arg7[%c11, %c0_53] : memref<16x1024xf32, #tpu.memory_space<vmem>>, vector<1x1xf32>
    %100 = vector.broadcast %98 : vector<1x512xf32> to vector<8x512xf32>
    %101 = arith.mulf %97, %100 : vector<8x512xf32>
    %cst_54 = arith.constant dense<0.000000e+00> : vector<8xf32>
    %102 = vector.multi_reduction <add>, %101, %cst_54 [1] : vector<8x512xf32> to vector<8xf32>
    %103 = vector.shape_cast %102 : vector<8xf32> to vector<8x1xf32>
    %104 = vector.broadcast %99 : vector<1x1xf32> to vector<8x1xf32>
    %105 = arith.addf %103, %104 : vector<8x1xf32>
    %c0_55 = arith.constant 0 : index
    %c0_56 = arith.constant 0 : index
    %106 = vector.load %arg8[%c0_55, %c0_56] : memref<8x1xf32, #tpu.memory_space<vmem>>, vector<8x1xf32>
    tpu.vector_store %arg8[%c0_55, %c0_56], %105 {strides = array<i32>} : memref<8x1xf32, #tpu.memory_space<vmem>>, vector<8x1xf32>,
    return
  }
  func.func @transform_0(%arg0: i32) -> (i32, i32) {
    %c0_i32 = arith.constant 0 : i32
    %c0_i32_0 = arith.constant 0 : i32
    return %arg0, %c0_i32 : i32, i32
  }
  func.func @transform_1(%arg0: i32) -> (i32, i32) {
    %c0_i32 = arith.constant 0 : i32
    %c0_i32_0 = arith.constant 0 : i32
    %c0_i32_1 = arith.constant 0 : i32
    return %c0_i32, %c0_i32_0 : i32, i32
  }
  func.func @transform_2(%arg0: i32) -> (i32, i32) {
    %c0_i32 = arith.constant 0 : i32
    %c0_i32_0 = arith.constant 0 : i32
    %c0_i32_1 = arith.constant 0 : i32
    return %c0_i32, %c0_i32_0 : i32, i32
  }
  func.func @transform_3(%arg0: i32) -> (i32, i32) {
    %c0_i32 = arith.constant 0 : i32
    %c0_i32_0 = arith.constant 0 : i32
    %c0_i32_1 = arith.constant 0 : i32
    return %c0_i32, %c0_i32_0 : i32, i32
  }
  func.func @transform_4(%arg0: i32) -> (i32, i32) {
    %c0_i32 = arith.constant 0 : i32
    %c0_i32_0 = arith.constant 0 : i32
    %c0_i32_1 = arith.constant 0 : i32
    return %c0_i32, %c0_i32_0 : i32, i32
  }
  func.func @transform_5(%arg0: i32) -> (i32, i32) {
    %c0_i32 = arith.constant 0 : i32
    %c0_i32_0 = arith.constant 0 : i32
    %c0_i32_1 = arith.constant 0 : i32
    return %c0_i32, %c0_i32_0 : i32, i32
  }
  func.func @transform_6(%arg0: i32) -> (i32, i32) {
    %c0_i32 = arith.constant 0 : i32
    %c0_i32_0 = arith.constant 0 : i32
    %c0_i32_1 = arith.constant 0 : i32
    return %c0_i32, %c0_i32_0 : i32, i32
  }
  func.func @transform_7(%arg0: i32) -> (i32, i32) {
    %c0_i32 = arith.constant 0 : i32
    %c0_i32_0 = arith.constant 0 : i32
    return %arg0, %c0_i32 : i32, i32
  }
}

</mosaic_0001>

<bundles_post_ra>
// kernel: mlpnet_forward.1
= control target key start
LH: loop header
LB: loop body
LE: loop exit
PB: predicated region body
PF: predicated region fallthrough
CT: control target
= control target key end

     0   :  { %12 = vsyncpa [#allocation3], 0  ;;  %s6269_s0 = inlined_call_operand.vmem [shape: f32[8,128], index: 0, kind: input, shape index: {}]   ;;  %s6270_s1 = inlined_call_operand.hbm [shape: bf16[768,128], index: 1, kind: input, shape index: {}]   ;;  %s6271_s2 = inlined_call_operand.hbm [shape: bf16[896,256], index: 2, kind: input, shape index: {}]   ;;  %s6272_s3 = inlined_call_operand.hbm [shape: bf16[256,384], index: 3, kind: input, shape index: {}]   ;;  %s6273_s4 = inlined_call_operand.hbm [shape: bf16[1024,512], index: 4, kind: input, shape index: {}]   ;;  %s6274_s5 = inlined_call_operand.hbm [shape: bf16[128,1024], index: 5, kind: input, shape index: {}]   ;;  %s6275_s6 = inlined_call_operand.hbm [shape: f32[16,1024], index: 6, kind: input, shape index: {}]   ;;  %s6276_s7 = inlined_call_operand.vmem [shape: f32[8,1], index: 7, kind: output, shape index: {}]  }
   0x1   :  { %13 = vsyncpa [#allocation5], 0 }
   0x2   :  { %14 = vsyncpa [#allocation8], 0 }
   0x3   :  { %15 = vsyncpa [#allocation11], 0  ;;  %s6060_s24 = smov [#allocation4]  }
   0x4   :  { %s35_s25 = sshll.u32 %s6060_s24, 4  ;;  %s36_s25 = int_to_ptr.vmem [resolvable:$true] %s35_s25 }
   0x5   :  { %s5940_s26 = scalar_lea.vmem %s36_s25, 14336  ;;  %p5945_p1 = scmp.lt.s32.totalorder %s36_s25, %s36_s25 }
   0x6   :  { %p5941_p0 = scmp.ne.s32.totalorder %s36_s25, %s5940_s26  ;;  %p5946_p2 = scmp.lt.s32.totalorder %s5940_s26, %s5940_s26 }
   0x8   :  { %p5947_p3 = por %p5946_p2, %p5945_p1 }
   0xa   :  { %p5948_p4 = pnand %p5947_p3, %p5941_p0 }
   0xc   :  { %5951 = shalt.err (!%p5948_p4)
}
   0xd   :  { %s6061_s27 = smov 128   ;;  %s6062_s28 = smov 8  }
   0xe   :  { %41 = dma.hbm_to_vmem [thread:$0]  %s6271_s2, 14336, %s36_s25, [#allocation5], %s6061_s27, %s6061_s27, %s6062_s28  }
   0xf   :  { %s6063_s8 = smov [#allocation7]  }
  0x10   :  { %s59_s9 = sshll.u32 %s6063_s8, 4  ;;  %s60_s9 = int_to_ptr.vmem [resolvable:$true] %s59_s9 }
  0x11   :  { %s5960_s10 = scalar_lea.vmem %s60_s9, 32768  ;;  %p5965_p6 = scmp.lt.s32.totalorder %s60_s9, %s60_s9 }
  0x12   :  { %p5961_p5 = scmp.ne.s32.totalorder %s60_s9, %s5960_s10  ;;  %p5966_p7 = scmp.lt.s32.totalorder %s5960_s10, %s5960_s10 }
  0x14   :  { %p5967_p8 = por %p5966_p7, %p5965_p6 }
  0x16   :  { %p5968_p9 = pnand %p5967_p8, %p5961_p5 }
  0x18   :  { %5971 = shalt.err (!%p5968_p9)
}
  0x19   :  { %s6064_s11 = smov 256   ;;  %s6065_s12 = smov 16  }
  0x1a   :  { %65 = dma.hbm_to_vmem [thread:$0]  %s6273_s4, 32768, %s60_s9, [#allocation8], %s6064_s11, %s6064_s11, %s6065_s12  }
  0x1b   :  { %s6066_s15 = smov [#allocation2]  }
  0x1c   :  { %s23_s16 = sshll.u32 %s6066_s15, 4  ;;  %s24_s16 = int_to_ptr.vmem [resolvable:$true] %s23_s16 }
  0x1d   :  { %s5980_s2 = scalar_lea.vmem %s24_s16, 6144  ;;  %p5985_p11 = scmp.lt.s32.totalorder %s24_s16, %s24_s16 }
  0x1e   :  { %p5981_p10 = scmp.ne.s32.totalorder %s24_s16, %s5980_s2  ;;  %p5986_p12 = scmp.lt.s32.totalorder %s5980_s2, %s5980_s2 }
  0x20   :  { %p5987_p13 = por %p5986_p12, %p5985_p11 }
  0x22   :  { %p5988_p0 = pnand %p5987_p13, %p5981_p10 }
  0x24   :  { %5991 = shalt.err (!%p5988_p0)
}
  0x25   :  { %s6067_s17 = smov 64   ;;  %s6068_s18 = smov 4  }
  0x26   :  { %29 = dma.hbm_to_vmem [thread:$0]  %s6270_s1, 6144, %s24_s16, [#allocation3], %s6067_s17, %s6067_s17, %s6068_s18  }
  0x27   :  { %s6069_s21 = smov [#allocation6]  }
  0x28   :  { %s47_s4 = sshll.u32 %s6069_s21, 4  ;;  %s48_s4 = int_to_ptr.vmem [resolvable:$true] %s47_s4 }
  0x29   :  { %s6000_s22 = scalar_lea.vmem %s48_s4, 6144  ;;  %p6005_p2 = scmp.lt.s32.totalorder %s48_s4, %s48_s4 }
  0x2a   :  { %p6001_p1 = scmp.ne.s32.totalorder %s48_s4, %s6000_s22  ;;  %p6006_p3 = scmp.lt.s32.totalorder %s6000_s22, %s6000_s22 }
  0x2c   :  { %p6007_p4 = por %p6006_p3, %p6005_p2 }
  0x2e   :  { %p6008_p5 = pnand %p6007_p4, %p6001_p1 }
  0x30   :  { %6011 = shalt.err (!%p6008_p5)
}
  0x31   :  { %s6070_s23 = smov 192   ;;  %s6071_s24 = smov 12  }
  0x32   :  { %53 = dma.hbm_to_vmem [thread:$0]  %s6272_s3, 6144, %s48_s4, [#allocation5], %s6070_s23, %s6070_s23, %s6071_s24  }
  0x33   :  { %s6072_s27 = smov [#allocation9]  }
  0x34   :  { %s71_s28 = sshll.u32 %s6072_s27, 4  ;;  %s72_s28 = int_to_ptr.vmem [resolvable:$true] %s71_s28 }
  0x35   :  { %s6020_s1 = scalar_lea.vmem %s72_s28, 8192  ;;  %p6025_p7 = scmp.lt.s32.totalorder %s72_s28, %s72_s28 }
  0x36   :  { %p6021_p6 = scmp.ne.s32.totalorder %s72_s28, %s6020_s1  ;;  %p6026_p8 = scmp.lt.s32.totalorder %s6020_s1, %s6020_s1 }
  0x38   :  { %p6027_p9 = por %p6026_p8, %p6025_p7 }
  0x3a   :  { %p6028_p10 = pnand %p6027_p9, %p6021_p6 }
  0x3c   :  { %6031 = shalt.err (!%p6028_p10)
}
  0x3d   :  { %s6073_s29 = smov 512   ;;  %s6074_s30 = smov 32  }
  0x3e   :  { %77 = dma.hbm_to_vmem [thread:$0]  %s6274_s5, 8192, %s72_s28, [#allocation8], %s6073_s29, %s6073_s29, %s6074_s30  }
  0x3f   :  { %s6075_s10 = smov [#allocation10]  }
  0x40   :  { %s83_s11 = sshll.u32 %s6075_s10, 4  ;;  %s84_s11 = int_to_ptr.vmem [resolvable:$true] %s83_s11 }
  0x41   :  { %s6040_s3 = scalar_lea.vmem %s84_s11, 2048  ;;  %p6045_p12 = scmp.lt.s32.totalorder %s84_s11, %s84_s11 }
  0x42   :  { %p6041_p11 = scmp.ne.s32.totalorder %s84_s11, %s6040_s3  ;;  %p6046_p13 = scmp.lt.s32.totalorder %s6040_s3, %s6040_s3 }
  0x44   :  { %p6047_p0 = por %p6046_p13, %p6045_p12 }
  0x46   :  { %p6048_p1 = pnand %p6047_p0, %p6041_p11 }
  0x48   :  { %6051 = shalt.err (!%p6048_p1)
}
  0x49   :  { %s6076_s12 = smov 1024  }
  0x4a   :  { %89 = dma.hbm_to_vmem [thread:$0]  %s6275_s6, 2048, %s84_s11, [#allocation11], %s6076_s12, %s6076_s12, %s6067_s17  }
  0x4b   :  { %6052 = dma.done.wait [#allocation3], 6144  }
  0x4c   :  { %6053 = vsyncadd [#allocation3], 4294961152 }
  0x4d   :  { %6054 = dma.done.wait [#allocation5], 20480  }
  0x4e   :  { %6055 = vsyncadd [#allocation5], 4294946816 }
  0x4f   :  { %6056 = dma.done.wait [#allocation8], 40960  }
  0x50   :  { %6057 = vsyncadd [#allocation8], 4294926336 }
  0x51   :  { %6058 = dma.done.wait [#allocation11], 2048  }
  0x52   :  { %6059 = vsyncadd [#allocation11], 4294965248  ;;  %v6077_v0 = vmov 0.0   ;;  %vm6078_vm0 = vmmov 0   ;;  %v5268_v1 = vld [vmem:[#allocation2 + $0x38] sm:$0xff]   ;;  %v5269_v2 = vld [vmem:[#allocation2 + $0x30] sm:$0xff]  }
  0x53   :  { %5208 = vmatprep.subr.bf16.mxu0 %v6077_v0  ;;  %5224 = vmatprep.mubr.msk.bf16.mxu0 %vm6078_vm0, %v6077_v0  ;;  %v5270_v3 = vld [vmem:[#allocation2 + $0x28] sm:$0xff]   ;;  %v5276_v4 = vld [vmem:[#allocation4 + $0x74] ss:$8 sps:$4 sm:$0xff]   ;;  %v5278_v5 = vld [vmem:[#allocation4 + $0x70] ss:$8 sps:$4 sm:$0xff]   ;;  %v6079_v27 = vmov 0  }
  0x54   :  { %5209 = vmatpush3.bf16.msra.mxu0 %v5268_v1  ;;  %v5271_v6 = vld [vmem:[#allocation2 + $0x20] sm:$0xff]   ;;  %328 = vmatprep.subr.bf16.mxu1 %v5276_v4  ;;  %v5282_v9 = vld [vmem:[#allocation4 + $0x54] ss:$8 sps:$4 sm:$0xff]   ;;  %v5284_v12 = vld [vmem:[#allocation4 + $0x50] ss:$8 sps:$4 sm:$0xff]   ;;  %vm4586_vm1 = vcmask 7168  }
  0x55   :  { %5210 = vmatprep.subr.bf16.mxu0 %v6077_v0  ;;  %v5279_v7 = vld [vmem:[#allocation4 + $0x64] ss:$8 sps:$4 sm:$0xff]   ;;  %329 = vmatpush1.bf16.msra.mxu1 %v5278_v5  ;;  %v5281_v8 = vld [vmem:[#allocation4 + $0x60] ss:$8 sps:$4 sm:$0xff]   ;;  %v5272_v10 = vld [vmem:[#allocation2 + $0x18] sm:$0xff]  }
  0x56   :  { %330 = vmatprep.subr.bf16.mxu1 %v5279_v7  ;;  %v5273_v11 = vld [vmem:[#allocation2 + $0x10] sm:$0xff]   ;;  %v5285_v13 = vld [vmem:[#allocation4 + $0x44] ss:$8 sps:$4 sm:$0xff]   ;;  %v5287_v14 = vld [vmem:[#allocation4 + $0x40] ss:$8 sps:$4 sm:$0xff]   ;;  %360 = vmatprep.mubr.bf16.mxu1 %v6079_v27 }
  0x57   :  { %v5288_v15 = vld [vmem:[#allocation4 + $0x34] ss:$8 sps:$4 sm:$0xff]   ;;  %v5274_v16 = vld [vmem:[#allocation2 + $0x8] sm:$0xff]   ;;  %v5290_v17 = vld [vmem:[#allocation4 + $0x30] ss:$8 sps:$4 sm:$0xff]  }
  0x58   :  { %5211 = vmatpush3.bf16.msra.mxu0 %v5269_v2  ;;  %v5291_v18 = vld [vmem:[#allocation4 + $0x24] ss:$8 sps:$4 sm:$0xff]   ;;  %v5293_v21 = vld [vmem:[#allocation4 + $0x20] ss:$8 sps:$4 sm:$0xff]   ;;  %v5294_v23 = vld [vmem:[#allocation4 + $0x14] ss:$8 sps:$4 sm:$0xff]  }
  0x59   :  { %5212 = vmatprep.subr.bf16.mxu0 %v6077_v0  ;;  %331 = vmatpush1.bf16.msra.mxu1 %v5281_v8  ;;  %v5275_v19 = vld [vmem:[#allocation2] sm:$0xff]   ;;  %v5296_v24 = vld [vmem:[#allocation4 + $0x10] ss:$8 sps:$4 sm:$0xff]   ;;  %v5300_v28 = vld [vmem:[#allocation6 + $0xa8] ss:$12 sps:$4 sm:$0xff]  }
  0x5a   :  { %332 = vmatprep.subr.bf16.mxu1 %v5282_v9  ;;  %v109_v20 = vld [vmem:[%s6269_s0] sm:$0xff]  ;;  %v5302_v29 = vld [vmem:[#allocation6 + $0xac] ss:$12 sps:$4 sm:$0xff]   ;;  %v5303_v31 = vld [vmem:[#allocation6 + $0x90] ss:$12 sps:$4 sm:$0xff]  }
  0x5b   :  { %v127_v22 = vpack.c.bf16 %v109_v20, %v109_v20  ;;  %v5297_v25 = vld [vmem:[#allocation4 + $0x4] ss:$8 sps:$4 sm:$0xff]   ;;  %v5299_v26 = vld [vmem:[#allocation4] ss:$8 sps:$4 sm:$0xff]   ;;  %v5327_v33 = vld [vmem:[#allocation6 + $0x170] ss:$12 sps:$4 sm:$0xff]  }
  0x5c   :  { %5213 = vmatpush3.bf16.msra.mxu0 %v5270_v3  ;;  %v5305_v30 = vld [vmem:[#allocation6 + $0x94] ss:$12 sps:$4 sm:$0xff]   ;;  %v5308_v32 = vld [vmem:[#allocation6 + $0x7c] ss:$12 sps:$4 sm:$0xff]   ;;  %v5306_v34 = vld [vmem:[#allocation6 + $0x78] ss:$12 sps:$4 sm:$0xff]  }
  0x5d   :  { %5214 = vmatprep.subr.bf16.mxu0 %v6077_v0  ;;  %333 = vmatpush1.bf16.msra.mxu1 %v5284_v12  ;;  %v5311_v35 = vld [vmem:[#allocation6 + $0x64] ss:$12 sps:$4 sm:$0xff]   ;;  %v5309_v36 = vld [vmem:[#allocation6 + $0x60] ss:$12 sps:$4 sm:$0xff]   ;;  %v5312_v38 = vld [vmem:[#allocation6 + $0x48] ss:$12 sps:$4 sm:$0xff]  }
  0x5e   :  { %334 = vmatprep.subr.bf16.mxu1 %v5285_v13  ;;  %v5314_v37 = vld [vmem:[#allocation6 + $0x4c] ss:$12 sps:$4 sm:$0xff]   ;;  %v5317_v39 = vld [vmem:[#allocation6 + $0x34] ss:$12 sps:$4 sm:$0xff]   ;;  %v5315_v40 = vld [vmem:[#allocation6 + $0x30] ss:$12 sps:$4 sm:$0xff]  }
  0x5f   :  { %v5320_v41 = vld [vmem:[#allocation6 + $0x1c] ss:$12 sps:$4 sm:$0xff]   ;;  %v5318_v42 = vld [vmem:[#allocation6 + $0x18] ss:$12 sps:$4 sm:$0xff]   ;;  %v5321_v44 = vld [vmem:[#allocation6] ss:$12 sps:$4 sm:$0xff]  }
  0x60   :  { %5215 = vmatpush3.bf16.msra.mxu0 %v5271_v6  ;;  %v5323_v43 = vld [vmem:[#allocation6 + $0x4] ss:$12 sps:$4 sm:$0xff]   ;;  %v5326_v45 = vld [vmem:[#allocation6 + $0x16c] ss:$12 sps:$4 sm:$0xff]   ;;  %v5324_v46 = vld [vmem:[#allocation6 + $0x168] ss:$12 sps:$4 sm:$0xff]  }
  0x61   :  { %5216 = vmatprep.subr.bf16.mxu0 %v6077_v0  ;;  %335 = vmatpush1.bf16.msra.mxu1 %v5287_v14  ;;  %v5331_v47 = vld [vmem:[#allocation6 + $0x154] ss:$12 sps:$4 sm:$0xff]   ;;  %v5329_v48 = vld [vmem:[#allocation6 + $0x150] ss:$12 sps:$4 sm:$0xff]   ;;  %v5334_v50 = vld [vmem:[#allocation6 + $0x138] ss:$12 sps:$4 sm:$0xff]  }
  0x62   :  { %336 = vmatprep.subr.bf16.mxu1 %v5288_v15  ;;  %v5336_v49 = vld [vmem:[#allocation6 + $0x13c] ss:$12 sps:$4 sm:$0xff]   ;;  %v5341_v51 = vld [vmem:[#allocation6 + $0x124] ss:$12 sps:$4 sm:$0xff]   ;;  %v5339_v52 = vld [vmem:[#allocation6 + $0x120] ss:$12 sps:$4 sm:$0xff]  }
  0x63   :  { %v5346_v53 = vld [vmem:[#allocation6 + $0x10c] ss:$12 sps:$4 sm:$0xff]   ;;  %v5344_v54 = vld [vmem:[#allocation6 + $0x108] ss:$12 sps:$4 sm:$0xff]   ;;  %v126_v55 = vld [vmem:[#allocation10] ss:$0 sm:$0xff] }
  0x64   :  { %5217 = vmatpush3.bf16.msra.mxu0 %v5272_v10  ;;  %v5328_v63 = vld [vmem:[#allocation6 + $0xb0] ss:$12 sps:$4 sm:$0xff]   ;;  %v5332_v2 = vld [vmem:[#allocation6 + $0x158] ss:$12 sps:$4 sm:$0xff]   ;;  %v5337_v4 = vld [vmem:[#allocation6 + $0x140] ss:$12 sps:$4 sm:$0xff]  }
  0x65   :  { %5218 = vmatprep.subr.bf16.mxu0 %v6077_v0  ;;  %337 = vmatpush1.bf16.msra.mxu1 %v5290_v17  ;;  %v5333_v3 = vld [vmem:[#allocation6 + $0x98] ss:$12 sps:$4 sm:$0xff]   ;;  %v5338_v5 = vld [vmem:[#allocation6 + $0x80] ss:$12 sps:$4 sm:$0xff]   ;;  %v5342_v6 = vld [vmem:[#allocation6 + $0x128] ss:$12 sps:$4 sm:$0xff]  }
  0x66   :  { %338 = vmatprep.subr.bf16.mxu1 %v5291_v18  ;;  %v5343_v7 = vld [vmem:[#allocation6 + $0x68] ss:$12 sps:$4 sm:$0xff]   ;;  %v5347_v8 = vld [vmem:[#allocation6 + $0x110] ss:$12 sps:$4 sm:$0xff]   ;;  %v5353_v13 = vld [vmem:[#allocation6 + $0x38] ss:$12 sps:$4 sm:$0xff]  }
  0x67   :  { %v5348_v9 = vld [vmem:[#allocation6 + $0x50] ss:$12 sps:$4 sm:$0xff]   ;;  %v5351_v10 = vld [vmem:[#allocation6 + $0xf4] ss:$12 sps:$4 sm:$0xff]  }
  0x68   :  { %5219 = vmatpush3.bf16.msra.mxu0 %v5273_v11  ;;  %v5352_v11 = vld [vmem:[#allocation6 + $0xf8] ss:$12 sps:$4 sm:$0xff]   ;;  %v5349_v12 = vld [vmem:[#allocation6 + $0xf0] ss:$12 sps:$4 sm:$0xff]   ;;  %v5357_v15 = vld [vmem:[#allocation6 + $0xe0] ss:$12 sps:$4 sm:$0xff]  }
  0x69   :  { %5220 = vmatprep.subr.bf16.mxu0 %v6077_v0  ;;  %339 = vmatpush1.bf16.msra.mxu1 %v5293_v21  ;;  %v5356_v14 = vld [vmem:[#allocation6 + $0xdc] ss:$12 sps:$4 sm:$0xff]   ;;  %v5358_v17 = vld [vmem:[#allocation6 + $0x20] ss:$12 sps:$4 sm:$0xff]   ;;  %v5361_v18 = vld [vmem:[#allocation6 + $0xc4] ss:$12 sps:$4 sm:$0xff]  }
  0x6a   :  { %340 = vmatprep.subr.bf16.mxu1 %v5294_v23  ;;  %v5359_v20 = vld [vmem:[#allocation6 + $0xc0] ss:$12 sps:$4 sm:$0xff]   ;;  %v5363_v21 = vld [vmem:[#allocation6 + $0x8] ss:$12 sps:$4 sm:$0xff]  }
  0x6b   :  { %v5393_v23 = vld [vmem:[#allocation4 + $0x1f4] ss:$8 sps:$4 sm:$0xff]  }
  0x6c   :  { %5221 = vmatpush3.bf16.msra.mxu0 %v5274_v16  ;;  %v5354_v16 = vld [vmem:[#allocation6 + $0xd8] ss:$12 sps:$4 sm:$0xff]  }
  0x6d   :  { %5222 = vmatprep.subr.bf16.mxu0 %v6077_v0  ;;  %341 = vmatpush1.bf16.msra.mxu1 %v5296_v24  ;;  %v238_v24 = vlaneseq }
  0x6e   :  { %342 = vmatprep.subr.bf16.mxu1 %v5297_v25 }
  0x6f   :  { %v6155_v25 = vshrl.u32 %v238_v24, 7  ;;  %v5430_v24 = vld [vmem:[#allocation4 + $0x100] ss:$8 sps:$4 sm:$0xff]  }
  0x70   :  { %5223 = vmatpush3.bf16.msra.mxu0 %v5275_v19  ;;  %v5362_v19 = vld [vmem:[#allocation6 + $0xc8] ss:$12 sps:$4 sm:$0xff]  }
  0x71   :  { %343 = vmatpush1.bf16.msra.mxu1 %v5299_v26  ;;  %713 = vmatprep.subr.bf16.mxu0 %v5302_v29  ;;  %v6158_v26 = vsub.s32 0, %v6155_v25  ;;  %v6161_v29 = vsub.s32 1, %v6155_v25 }
  0x72   :  { %5133 = vmatprep.subr.bf16.mxu1 %v5327_v33 }
  0x73   :  { %5225 = vmatmul.mubr.bf16.vlgmr.msra.gmra.mxu0 %v127_v22  ;;  %v5366_v22 = vld [vmem:[#allocation4 + $0xf4] ss:$8 sps:$4 sm:$0xff]  }
  0x74   :  { %714 = vmatpush1.bf16.msra.mxu0 %v5300_v28  ;;  %v235_v28 = vld [vmem:[#allocation10 + $0x1] ss:$8 sm:$0x3] }
  0x75   :  { %715 = vmatprep.subr.bf16.mxu0 %v5305_v30  ;;  %v241_v30 = vrot.slane %v235_v28, %v6158_v26 }
  0x78   :  { %716 = vmatpush1.bf16.msra.mxu0 %v5303_v31  ;;  %v245_v31 = vrot.slane %v235_v28, %v6161_v29  ;;  %v5435_v28 = vld [vmem:[#allocation4 + $0x184] ss:$8 sps:$4 sm:$0xff]  }
  0x79   :  { %717 = vmatprep.subr.bf16.mxu0 %v5308_v32 }
  0x7c   :  { %718 = vmatpush1.bf16.msra.mxu0 %v5306_v34 }
  0x7d   :  { %719 = vmatprep.subr.bf16.mxu0 %v5311_v35 }
  0x80   :  { %720 = vmatpush1.bf16.msra.mxu0 %v5309_v36 }
  0x81   :  { %721 = vmatprep.subr.bf16.mxu0 %v5314_v37 }
  0x84   :  { %722 = vmatpush1.bf16.msra.mxu0 %v5312_v38 }
  0x85   :  { %723 = vmatprep.subr.bf16.mxu0 %v5317_v39 }
  0x88   :  { %724 = vmatpush1.bf16.msra.mxu0 %v5315_v40 }
  0x89   :  { %725 = vmatprep.subr.bf16.mxu0 %v5320_v41 }
  0x8c   :  { %726 = vmatpush1.bf16.msra.mxu0 %v5318_v42 }
  0x8d   :  { %727 = vmatprep.subr.bf16.mxu0 %v5323_v43  ;;  %v5364_v43 = vld [vmem:[#allocation4 + $0xf0] ss:$8 sps:$4 sm:$0xff]  }
  0x90   :  { %728 = vmatpush1.bf16.msra.mxu0 %v5321_v44  ;;  %v5391_v44 = vld [vmem:[#allocation4 + $0x1f0] ss:$8 sps:$4 sm:$0xff]  }
  0x91   :  { %729 = vmatprep.subr.bf16.mxu0 %v5326_v45 }
  0x94   :  { %730 = vmatpush2.bf16.msra.mxu0 %v5324_v46  ;;  %v5369_v46 = vld [vmem:[#allocation4 + $0xe4] ss:$8 sps:$4 sm:$0xff]  }
  0x95   :  { %731 = vmatprep.subr.bf16.mxu0 %v5331_v47  ;;  %v5399_v47 = vld [vmem:[#allocation4 + $0x1e4] ss:$8 sps:$4 sm:$0xff]  }
  0x98   :  { %732 = vmatpush2.bf16.msra.mxu0 %v5329_v48  ;;  %v5367_v48 = vld [vmem:[#allocation4 + $0xe0] ss:$8 sps:$4 sm:$0xff]  }
  0x99   :  { %733 = vmatprep.subr.bf16.mxu0 %v5336_v49  ;;  %v5397_v49 = vld [vmem:[#allocation4 + $0x1e0] ss:$8 sps:$4 sm:$0xff]  }
  0x9c   :  { %734 = vmatpush2.bf16.msra.mxu0 %v5334_v50  ;;  %v5372_v50 = vld [vmem:[#allocation4 + $0xd4] ss:$8 sps:$4 sm:$0xff]  }
  0x9d   :  { %735 = vmatprep.subr.bf16.mxu0 %v5341_v51  ;;  %v5405_v51 = vld [vmem:[#allocation4 + $0x1d4] ss:$8 sps:$4 sm:$0xff]  }
  0xa0   :  { %736 = vmatpush2.bf16.msra.mxu0 %v5339_v52  ;;  %v5370_v52 = vld [vmem:[#allocation4 + $0xd0] ss:$8 sps:$4 sm:$0xff]  }
  0xa1   :  { %737 = vmatprep.subr.bf16.mxu0 %v5346_v53  ;;  %v5403_v53 = vld [vmem:[#allocation4 + $0x1d0] ss:$8 sps:$4 sm:$0xff]  }
  0xa4   :  { %738 = vmatpush2.bf16.msra.mxu0 %v5344_v54  ;;  %v5375_v54 = vld [vmem:[#allocation4 + $0xc4] ss:$8 sps:$4 sm:$0xff]  }
  0xa5   :  { %739 = vmatprep.subr.bf16.mxu0 %v5351_v10  ;;  %v5400_v10 = vld [vmem:[#allocation4 + $0x150] ss:$8 sps:$4 sm:$0xff]  }
  0xa8   :  { %740 = vmatpush2.bf16.msra.mxu0 %v5349_v12  ;;  %v5406_v12 = vld [vmem:[#allocation4 + $0x140] ss:$8 sps:$4 sm:$0xff]  }
  0xa9   :  { %741 = vmatprep.subr.bf16.mxu0 %v5356_v14  ;;  %v5412_v14 = vld [vmem:[#allocation4 + $0x130] ss:$8 sps:$4 sm:$0xff]  }
  0xac   :  { %742 = vmatpush2.bf16.msra.mxu0 %v5354_v16  ;;  %v5418_v16 = vld [vmem:[#allocation4 + $0x120] ss:$8 sps:$4 sm:$0xff]  }
  0xad   :  { %743 = vmatprep.subr.bf16.mxu0 %v5361_v18  ;;  %v5421_v18 = vld [vmem:[#allocation4 + $0x1a0] ss:$8 sps:$4 sm:$0xff]  }
  0xb0   :  { %744 = vmatpush2.bf16.msra.mxu0 %v5359_v20  ;;  %v5424_v20 = vld [vmem:[#allocation4 + $0x110] ss:$8 sps:$4 sm:$0xff]  }
  0xb1   :  { %1145 = vmatprep.subr.bf16.mxu0 %v5393_v23  ;;  %v5432_v23 = vld [vmem:[#allocation4 + $0x104] ss:$8 sps:$4 sm:$0xff]  }
 0x133   :  { %v210_v56 = vpop.f32.mrf.mxu0 }
 0x134   :  { %v211_v57 = vadd.f32 %v210_v56, %v126_v55  ;;  %v5411_v55 = vld [vmem:[#allocation4 + $0x1c4] ss:$8 sps:$4 sm:$0xff]   ;;  %v5373_v56 = vld [vmem:[#allocation4 + $0xc0] ss:$8 sps:$4 sm:$0xff]  }
 0x135   :  { %v5226_v58 = vpop.f32.mrf.mxu0 }
 0x136   :  { %v216_v59 = vmul.f32 0.01, %v211_v57  ;;  %v5378_v58 = vld [vmem:[#allocation4 + $0xb4] ss:$8 sps:$4 sm:$0xff]  }
 0x137   :  { %v213_v60 = vpop.f32.mrf.mxu0 }
 0x138   :  { %v217_v61 = vmax.f32 %v211_v57, %v216_v59  ;;  %v5409_v57 = vld [vmem:[#allocation4 + $0x1c0] ss:$8 sps:$4 sm:$0xff]   ;;  %v5417_v59 = vld [vmem:[#allocation4 + $0x1b4] ss:$8 sps:$4 sm:$0xff]   ;;  %v5376_v60 = vld [vmem:[#allocation4 + $0xb0] ss:$8 sps:$4 sm:$0xff]  }
 0x139   :  { %v5227_v62 = vpop.f32.mrf.mxu0 }
 0x13a   :  { %v236_v1 = vpack.c.bf16 %v217_v61, %v217_v61  ;;  %v5415_v61 = vld [vmem:[#allocation4 + $0x1b0] ss:$8 sps:$4 sm:$0xff]   ;;  %v5381_v62 = vld [vmem:[#allocation4 + $0xa4] ss:$8 sps:$4 sm:$0xff]  }
 0x13c   :  { %361 = vmatmul.mubr.bf16.vlgmr.msra.gmra.mxu1 %v236_v1  ;;  %v5384_v1 = vld [vmem:[#allocation4 + $0x94] ss:$8 sps:$4 sm:$0xff]  }
 0x13d   :  { %5134 = vmatpush3.bf16.msra.mxu1 %v5328_v63  ;;  %v5379_v63 = vld [vmem:[#allocation4 + $0xa0] ss:$8 sps:$4 sm:$0xff]  }
 0x13e   :  { %5135 = vmatprep.subr.bf16.mxu1 %v5332_v2  ;;  %v5382_v2 = vld [vmem:[#allocation4 + $0x90] ss:$8 sps:$4 sm:$0xff]  }
 0x141   :  { %5136 = vmatpush3.bf16.msra.mxu1 %v5333_v3  ;;  %v5387_v3 = vld [vmem:[#allocation4 + $0x84] ss:$8 sps:$4 sm:$0xff]  }
 0x142   :  { %5137 = vmatprep.subr.bf16.mxu1 %v5337_v4  ;;  %v5385_v4 = vld [vmem:[#allocation4 + $0x80] ss:$8 sps:$4 sm:$0xff]  }
 0x145   :  { %5138 = vmatpush3.bf16.msra.mxu1 %v5338_v5  ;;  %v5390_v5 = vld [vmem:[#allocation4 + $0x174] ss:$8 sps:$4 sm:$0xff]  }
 0x146   :  { %5139 = vmatprep.subr.bf16.mxu1 %v5342_v6  ;;  %v5388_v6 = vld [vmem:[#allocation4 + $0x170] ss:$8 sps:$4 sm:$0xff]  }
 0x149   :  { %5140 = vmatpush3.bf16.msra.mxu1 %v5343_v7  ;;  %v5396_v7 = vld [vmem:[#allocation4 + $0x164] ss:$8 sps:$4 sm:$0xff]  }
 0x14a   :  { %5141 = vmatprep.subr.bf16.mxu1 %v5347_v8  ;;  %v5394_v8 = vld [vmem:[#allocation4 + $0x160] ss:$8 sps:$4 sm:$0xff]  }
 0x14d   :  { %5142 = vmatpush3.bf16.msra.mxu1 %v5348_v9  ;;  %v5402_v9 = vld [vmem:[#allocation4 + $0x154] ss:$8 sps:$4 sm:$0xff]  }
 0x14e   :  { %5143 = vmatprep.subr.bf16.mxu1 %v5352_v11  ;;  %v5408_v11 = vld [vmem:[#allocation4 + $0x144] ss:$8 sps:$4 sm:$0xff]  }
 0x151   :  { %5144 = vmatpush3.bf16.msra.mxu1 %v5353_v13  ;;  %v5414_v13 = vld [vmem:[#allocation4 + $0x134] ss:$8 sps:$4 sm:$0xff]  }
 0x152   :  { %5145 = vmatprep.subr.bf16.mxu1 %v5357_v15  ;;  %v5420_v15 = vld [vmem:[#allocation4 + $0x124] ss:$8 sps:$4 sm:$0xff]  }
 0x155   :  { %5146 = vmatpush3.bf16.msra.mxu1 %v5358_v17  ;;  %v5423_v17 = vld [vmem:[#allocation4 + $0x1a4] ss:$8 sps:$4 sm:$0xff]  }
 0x156   :  { %5147 = vmatprep.subr.bf16.mxu1 %v5362_v19  ;;  %v5426_v19 = vld [vmem:[#allocation4 + $0x114] ss:$8 sps:$4 sm:$0xff]  }
 0x159   :  { %5148 = vmatpush3.bf16.msra.mxu1 %v5363_v21  ;;  %v5429_v21 = vld [vmem:[#allocation4 + $0x194] ss:$8 sps:$4 sm:$0xff]  }
 0x15a   :  { %1104 = vmatprep.subr.bf16.mxu1 %v5366_v22  ;;  %v5427_v22 = vld [vmem:[#allocation4 + $0x190] ss:$8 sps:$4 sm:$0xff]  }
 0x1fc   :  { %v362_v32 = vpop.f32.mrf.mxu1 }
 0x1fd   :  { %v363_v33 = vadd.f32 %v362_v32, %v241_v30  ;;  %v5433_v30 = vld [vmem:[#allocation4 + $0x180] ss:$8 sps:$4 sm:$0xff]  }
 0x1fe   :  { %v364_v34 = vpop.f32.mrf.mxu1  ;;  %v438_v32 = vld [vmem:[#allocation10 + $0x2] ss:$8 sm:$0x7] }
 0x1ff   :  { %v369_v35 = vmul.f32 0.01, %v363_v33  ;;  %v365_v36 = vadd.f32 %v364_v34, %v245_v31  ;;  %v5436_v31 = vld [vmem:[#allocation2 + $0xb8] sm:$0xff]   ;;  %v6169_v34 = vsub.s32 2, %v6155_v25 }
 0x200   :  { %v366_v37 = vpop.f32.mrf.mxu1 }
 0x201   :  { %v370_v38 = vmul.f32 0.01, %v365_v36  ;;  %v371_v39 = vmax.f32 %v363_v33, %v369_v35  ;;  %v445_v33 = vrot.slane %v438_v32, %v6158_v26  ;;  %v449_v35 = vrot.slane %v438_v32, %v6161_v29 }
 0x202   :  { %v367_v40 = vpop.f32.mrf.mxu1 }
 0x203   :  { %v372_v41 = vmax.f32 %v365_v36, %v370_v38  ;;  %v439_v45 = vpack.c.bf16 %v371_v39, %v371_v39  ;;  %v453_v39 = vrot.slane %v438_v32, %v6169_v34 }
 0x205   :  { %v440_v42 = vpack.c.bf16 %v372_v41, %v372_v41 }
 0x207   :  { %745 = vmatprep.mubr.bf16.mxu0 %v440_v42  ;;  %786 = vmatprep.mubr.bf16.mxu1 %v440_v42 }
 0x208   :  { %746 = vmatmul.mubr.bf16.vlgmr.msra.gmra.mxu0 %v439_v45  ;;  %787 = vmatmul.mubr.bf16.vlgmr.msra.gmra.mxu1 %v439_v45 }
 0x209   :  { %1105 = vmatpush1.bf16.msra.mxu1 %v5364_v43  ;;  %1146 = vmatpush1.bf16.msra.mxu0 %v5391_v44 }
 0x20a   :  { %1106 = vmatprep.subr.bf16.mxu1 %v5369_v46  ;;  %1147 = vmatprep.subr.bf16.mxu0 %v5399_v47 }
 0x20b   :  { %1177 = vmatprep.mubr.bf16.mxu0 %v6079_v27 }
 0x20d   :  { %1107 = vmatpush1.bf16.msra.mxu1 %v5367_v48  ;;  %1148 = vmatpush1.bf16.msra.mxu0 %v5397_v49 }
 0x20e   :  { %1108 = vmatprep.subr.bf16.mxu1 %v5372_v50  ;;  %1149 = vmatprep.subr.bf16.mxu0 %v5405_v51 }
 0x211   :  { %1109 = vmatpush1.bf16.msra.mxu1 %v5370_v52  ;;  %1150 = vmatpush1.bf16.msra.mxu0 %v5403_v53 }
 0x212   :  { %1110 = vmatprep.subr.bf16.mxu1 %v5375_v54  ;;  %1151 = vmatprep.subr.bf16.mxu0 %v5411_v55 }
 0x215   :  { %1111 = vmatpush1.bf16.msra.mxu1 %v5373_v56  ;;  %1152 = vmatpush1.bf16.msra.mxu0 %v5409_v57  ;;  %v5437_v57 = vld [vmem:[#allocation2 + $0x78] sm:$0xff]  }
 0x216   :  { %1112 = vmatprep.subr.bf16.mxu1 %v5378_v58  ;;  %1153 = vmatprep.subr.bf16.mxu0 %v5417_v59  ;;  %v5438_v59 = vld [vmem:[#allocation2 + $0xb0] sm:$0xff]  }
 0x219   :  { %1113 = vmatpush1.bf16.msra.mxu1 %v5376_v60  ;;  %1154 = vmatpush1.bf16.msra.mxu0 %v5415_v61  ;;  %v5439_v60 = vld [vmem:[#allocation2 + $0x70] sm:$0xff]   ;;  %v5440_v61 = vld [vmem:[#allocation2 + $0xa8] sm:$0xff]  }
 0x21a   :  { %1114 = vmatprep.subr.bf16.mxu1 %v5381_v62  ;;  %1155 = vmatprep.subr.bf16.mxu0 %v5423_v17  ;;  %v5441_v62 = vld [vmem:[#allocation2 + $0x68] sm:$0xff]  }
 0x21d   :  { %1115 = vmatpush1.bf16.msra.mxu1 %v5379_v63  ;;  %1156 = vmatpush1.bf16.msra.mxu0 %v5421_v18  ;;  %v5442_v63 = vld [vmem:[#allocation2 + $0xa0] sm:$0xff]  }
 0x21e   :  { %1116 = vmatprep.subr.bf16.mxu1 %v5384_v1  ;;  %1157 = vmatprep.subr.bf16.mxu0 %v5429_v21  ;;  %v5443_v1 = vld [vmem:[#allocation2 + $0x60] sm:$0xff]  }
 0x221   :  { %1117 = vmatpush1.bf16.msra.mxu1 %v5382_v2  ;;  %1158 = vmatpush1.bf16.msra.mxu0 %v5427_v22  ;;  %v5444_v2 = vld [vmem:[#allocation2 + $0x98] sm:$0xff]  }
 0x222   :  { %1118 = vmatprep.subr.bf16.mxu1 %v5387_v3  ;;  %1159 = vmatprep.subr.bf16.mxu0 %v5435_v28  ;;  %v5445_v3 = vld [vmem:[#allocation2 + $0x58] sm:$0xff]  }
 0x225   :  { %1119 = vmatpush1.bf16.msra.mxu1 %v5385_v4  ;;  %1160 = vmatpush1.bf16.msra.mxu0 %v5433_v30  ;;  %v5446_v4 = vld [vmem:[#allocation2 + $0x90] sm:$0xff]  }
 0x226   :  { %1120 = vmatprep.subr.bf16.mxu1 %v5390_v5  ;;  %5155 = vmatprep.subr.bf16.mxu0 %v5436_v31  ;;  %v5447_v5 = vld [vmem:[#allocation2 + $0x50] sm:$0xff]  }
 0x229   :  { %1121 = vmatpush2.bf16.msra.mxu1 %v5388_v6  ;;  %v5448_v6 = vld [vmem:[#allocation2 + $0x88] sm:$0xff]  }
 0x22a   :  { %1122 = vmatprep.subr.bf16.mxu1 %v5396_v7  ;;  %v5449_v7 = vld [vmem:[#allocation2 + $0x48] sm:$0xff]  }
 0x22d   :  { %1123 = vmatpush2.bf16.msra.mxu1 %v5394_v8  ;;  %v5450_v8 = vld [vmem:[#allocation2 + $0x80] sm:$0xff]  }
 0x22e   :  { %1124 = vmatprep.subr.bf16.mxu1 %v5402_v9  ;;  %v5451_v9 = vld [vmem:[#allocation2 + $0x40] sm:$0xff]  }
 0x231   :  { %1125 = vmatpush2.bf16.msra.mxu1 %v5400_v10  ;;  %v5452_v10 = vld [vmem:[#allocation2 + $0xf8] sm:$0xff]  }
 0x232   :  { %1126 = vmatprep.subr.bf16.mxu1 %v5408_v11  ;;  %v5453_v11 = vld [vmem:[#allocation2 + $0xf0] sm:$0xff]  }
 0x235   :  { %1127 = vmatpush2.bf16.msra.mxu1 %v5406_v12  ;;  %v5454_v12 = vld [vmem:[#allocation2 + $0xe8] sm:$0xff]  }
 0x236   :  { %1128 = vmatprep.subr.bf16.mxu1 %v5414_v13  ;;  %v5455_v13 = vld [vmem:[#allocation2 + $0xe0] sm:$0xff]  }
 0x239   :  { %1129 = vmatpush2.bf16.msra.mxu1 %v5412_v14  ;;  %v5456_v14 = vld [vmem:[#allocation2 + $0xd8] sm:$0xff]  }
 0x23a   :  { %1130 = vmatprep.subr.bf16.mxu1 %v5420_v15  ;;  %v849_v15 = vld [vmem:[#allocation10 + $0x3] ss:$8 sm:$0x3] }
 0x23b   :  { %v861_v17 = vrot.slane %v849_v15, %v6161_v29 }
 0x23d   :  { %1131 = vmatpush2.bf16.msra.mxu1 %v5418_v16  ;;  %v857_v16 = vrot.slane %v849_v15, %v6158_v26  ;;  %v5496_v15 = vld [vmem:[#allocation4 + $0x2b0] ss:$8 sps:$4 sm:$0xff]  }
 0x23e   :  { %1132 = vmatprep.subr.bf16.mxu1 %v5426_v19 }
 0x241   :  { %1133 = vmatpush2.bf16.msra.mxu1 %v5424_v20 }
 0x242   :  { %1134 = vmatprep.subr.bf16.mxu1 %v5432_v23 }
 0x245   :  { %1135 = vmatpush2.bf16.msra.mxu1 %v5430_v24 }
 0x246   :  { %5228 = vmatprep.subr.bf16.mxu1 %v6077_v0 }
 0x2c8   :  { %v747_v36 = vpop.f32.mrf.mxu0  ;;  %v5149_v37 = vpop.f32.mrf.mxu1 }
 0x2c9   :  { %v748_v38 = vadd.f32 %v747_v36, %v445_v33 }
 0x2ca   :  { %v749_v40 = vpop.f32.mrf.mxu0  ;;  %v5150_v41 = vpop.f32.mrf.mxu1 }
 0x2cb   :  { %v794_v42 = vmul.f32 0.01, %v748_v38  ;;  %v750_v43 = vadd.f32 %v749_v40, %v449_v35  ;;  %v5151_v44 = vadd.f32 %v5150_v41, %v5149_v37  ;;  %v5457_v41 = vld [vmem:[#allocation2 + $0xd0] sm:$0xff]  }
 0x2cc   :  { %v751_v45 = vpop.f32.mrf.mxu0  ;;  %v5152_v46 = vpop.f32.mrf.mxu1 }
 0x2cd   :  { %v795_v47 = vmul.f32 0.01, %v750_v43  ;;  %v789_v48 = vadd.f32 %v5151_v44, %v453_v39  ;;  %v797_v49 = vmax.f32 %v748_v38, %v794_v42  ;;  %v5458_v42 = vld [vmem:[#allocation2 + $0xc8] sm:$0xff]   ;;  %v5460_v44 = vld [vmem:[#allocation4 + $0x270] ss:$8 sps:$4 sm:$0xff]  }
 0x2ce   :  { %v752_v50 = vpop.f32.mrf.mxu0  ;;  %v5153_v51 = vpop.f32.mrf.mxu1  ;;  %v5462_v45 = vld [vmem:[#allocation4 + $0x274] ss:$8 sps:$4 sm:$0xff]   ;;  %v5465_v46 = vld [vmem:[#allocation4 + $0x264] ss:$8 sps:$4 sm:$0xff]  }
 0x2cf   :  { %v798_v52 = vmax.f32 %v750_v43, %v795_v47  ;;  %v796_v53 = vmul.f32 0.01, %v789_v48  ;;  %v850_v56 = vpack.c.bf16 %v797_v49, %v797_v49  ;;  %v5459_v43 = vld [vmem:[#allocation2 + $0xc0] sm:$0xff]   ;;  %v5466_v49 = vld [vmem:[#allocation4 + $0x250] ss:$8 sps:$4 sm:$0xff]  }
 0x2d0   :  { %v5463_v47 = vld [vmem:[#allocation4 + $0x260] ss:$8 sps:$4 sm:$0xff]   ;;  %v5471_v50 = vld [vmem:[#allocation4 + $0x244] ss:$8 sps:$4 sm:$0xff]  }
 0x2d1   :  { %v851_v54 = vpack.c.bf16 %v798_v52, %v798_v52  ;;  %v799_v55 = vmax.f32 %v789_v48, %v796_v53  ;;  %v5468_v48 = vld [vmem:[#allocation4 + $0x254] ss:$8 sps:$4 sm:$0xff]   ;;  %v5469_v51 = vld [vmem:[#allocation4 + $0x240] ss:$8 sps:$4 sm:$0xff]   ;;  %v5477_v53 = vld [vmem:[#allocation4 + $0x224] ss:$8 sps:$4 sm:$0xff]  }
 0x2d2   :  { %v5474_v52 = vld [vmem:[#allocation4 + $0x234] ss:$8 sps:$4 sm:$0xff]  }
 0x2d3   :  { %v852_v58 = vpack.c.bf16 %v799_v55, %v799_v55  ;;  %1136 = vmatprep.mubr.bf16.mxu1 %v851_v54  ;;  %v5475_v54 = vld [vmem:[#allocation4 + $0x220] ss:$8 sps:$4 sm:$0xff]  }
 0x2d4   :  { %1137 = vmatmul.mubr.bf16.vlgmr.msra.gmra.mxu1 %v850_v56  ;;  %v1222_v56 = vld [vmem:[#allocation10 + $0x4] ss:$0 sm:$0xff] }
 0x2d5   :  { %1178 = vmatmul.mubr.bf16.vlgmr.msra.gmra.mxu0 %v852_v58  ;;  %5244 = vmatprep.mubr.msk.bf16.mxu1 %vm6078_vm0, %v6077_v0 }
 0x2d6   :  { %5156 = vmatpush3.bf16.msra.mxu0 %v5437_v57  ;;  %5229 = vmatpush3.bf16.msra.mxu1 %v5452_v10  ;;  %v5492_v10 = vld [vmem:[#allocation4 + $0x2d4] ss:$8 sps:$4 sm:$0xff]  }
 0x2d7   :  { %5157 = vmatprep.subr.bf16.mxu0 %v5438_v59  ;;  %5230 = vmatprep.subr.bf16.mxu1 %v6077_v0 }
 0x2da   :  { %5158 = vmatpush3.bf16.msra.mxu0 %v5439_v60  ;;  %5231 = vmatpush3.bf16.msra.mxu1 %v5453_v11  ;;  %v5490_v11 = vld [vmem:[#allocation4 + $0x2d0] ss:$8 sps:$4 sm:$0xff]  }
 0x2db   :  { %5159 = vmatprep.subr.bf16.mxu0 %v5440_v61  ;;  %5232 = vmatprep.subr.bf16.mxu1 %v6077_v0 }
 0x2de   :  { %5160 = vmatpush3.bf16.msra.mxu0 %v5441_v62  ;;  %5233 = vmatpush3.bf16.msra.mxu1 %v5454_v12  ;;  %v5495_v12 = vld [vmem:[#allocation4 + $0x2c4] ss:$8 sps:$4 sm:$0xff]  }
 0x2df   :  { %5161 = vmatprep.subr.bf16.mxu0 %v5442_v63  ;;  %5234 = vmatprep.subr.bf16.mxu1 %v6077_v0 }
 0x2e2   :  { %5162 = vmatpush3.bf16.msra.mxu0 %v5443_v1  ;;  %5235 = vmatpush3.bf16.msra.mxu1 %v5455_v13  ;;  %v5493_v13 = vld [vmem:[#allocation4 + $0x2c0] ss:$8 sps:$4 sm:$0xff]  }
 0x2e3   :  { %5163 = vmatprep.subr.bf16.mxu0 %v5444_v2  ;;  %5236 = vmatprep.subr.bf16.mxu1 %v6077_v0  ;;  %v5480_v2 = vld [vmem:[#allocation4 + $0x214] ss:$8 sps:$4 sm:$0xff]  }
 0x2e6   :  { %5164 = vmatpush3.bf16.msra.mxu0 %v5445_v3  ;;  %5237 = vmatpush3.bf16.msra.mxu1 %v5456_v14  ;;  %v5478_v3 = vld [vmem:[#allocation4 + $0x210] ss:$8 sps:$4 sm:$0xff]   ;;  %v5498_v14 = vld [vmem:[#allocation4 + $0x2b4] ss:$8 sps:$4 sm:$0xff]  }
 0x2e7   :  { %5165 = vmatprep.subr.bf16.mxu0 %v5446_v4  ;;  %5238 = vmatprep.subr.bf16.mxu1 %v6077_v0  ;;  %v5483_v4 = vld [vmem:[#allocation4 + $0x204] ss:$8 sps:$4 sm:$0xff]  }
 0x2ea   :  { %5166 = vmatpush3.bf16.msra.mxu0 %v5447_v5  ;;  %5239 = vmatpush3.bf16.msra.mxu1 %v5457_v41  ;;  %v5481_v5 = vld [vmem:[#allocation4 + $0x200] ss:$8 sps:$4 sm:$0xff]  }
 0x2eb   :  { %5167 = vmatprep.subr.bf16.mxu0 %v5448_v6  ;;  %5240 = vmatprep.subr.bf16.mxu1 %v6077_v0  ;;  %v5484_v6 = vld [vmem:[#allocation4 + $0x2f0] ss:$8 sps:$4 sm:$0xff]  }
 0x2ee   :  { %5168 = vmatpush3.bf16.msra.mxu0 %v5449_v7  ;;  %5241 = vmatpush3.bf16.msra.mxu1 %v5458_v42  ;;  %v5486_v7 = vld [vmem:[#allocation4 + $0x2f4] ss:$8 sps:$4 sm:$0xff]  }
 0x2ef   :  { %5169 = vmatprep.subr.bf16.mxu0 %v5450_v8  ;;  %5242 = vmatprep.subr.bf16.mxu1 %v6077_v0  ;;  %v5472_v0 = vld [vmem:[#allocation4 + $0x230] ss:$8 sps:$4 sm:$0xff]   ;;  %v5489_v8 = vld [vmem:[#allocation4 + $0x2e4] ss:$8 sps:$4 sm:$0xff]  }
 0x2f2   :  { %5170 = vmatpush3.bf16.msra.mxu0 %v5451_v9  ;;  %5243 = vmatpush3.bf16.msra.mxu1 %v5459_v43  ;;  %v5487_v9 = vld [vmem:[#allocation4 + $0x2e0] ss:$8 sps:$4 sm:$0xff]  }
 0x2f3   :  { %1581 = vmatprep.subr.bf16.mxu0 %v5462_v45  ;;  %1833 = vmatprep.subr.bf16.mxu1 %v5486_v7 }
 0x394   :  { %v1138_v18 = vpop.f32.mrf.mxu1 }
 0x395   :  { %v1139_v19 = vadd.f32 %v1138_v18, %v857_v16  ;;  %v1179_v20 = vpop.f32.mrf.mxu0  ;;  %v5501_v16 = vld [vmem:[#allocation4 + $0x2a4] ss:$8 sps:$4 sm:$0xff]   ;;  %v5504_v18 = vld [vmem:[#allocation4 + $0x294] ss:$8 sps:$4 sm:$0xff]  }
 0x396   :  { %v1140_v21 = vpop.f32.mrf.mxu1 }
 0x397   :  { %v1180_v22 = vadd.f32 %v1179_v20, %v1139_v19  ;;  %v1141_v23 = vadd.f32 %v1140_v21, %v861_v17  ;;  %v1181_v24 = vpop.f32.mrf.mxu0  ;;  %v5499_v17 = vld [vmem:[#allocation4 + $0x2a0] ss:$8 sps:$4 sm:$0xff]   ;;  %v5502_v19 = vld [vmem:[#allocation4 + $0x290] ss:$8 sps:$4 sm:$0xff]   ;;  %v5507_v20 = vld [vmem:[#allocation4 + $0x284] ss:$8 sps:$4 sm:$0xff]  }
 0x398   :  { %v1142_v28 = vpop.f32.mrf.mxu1  ;;  %v5505_v21 = vld [vmem:[#allocation4 + $0x280] ss:$8 sps:$4 sm:$0xff]  }
 0x399   :  { %v1186_v30 = vmul.f32 0.01, %v1180_v22  ;;  %v1182_v31 = vadd.f32 %v1181_v24, %v1141_v23  ;;  %v1183_v32 = vpop.f32.mrf.mxu0  ;;  %v5508_v23 = vld [vmem:[#allocation4 + $0x370] ss:$8 sps:$4 sm:$0xff]   ;;  %v5513_v24 = vld [vmem:[#allocation4 + $0x364] ss:$8 sps:$4 sm:$0xff]  }
 0x39a   :  { %v1143_v33 = vpop.f32.mrf.mxu1  ;;  %v5511_v28 = vld [vmem:[#allocation4 + $0x360] ss:$8 sps:$4 sm:$0xff]   ;;  %v5519_v32 = vld [vmem:[#allocation4 + $0x344] ss:$8 sps:$4 sm:$0xff]  }
 0x39b   :  { %v1187_v35 = vmul.f32 0.01, %v1182_v31  ;;  %v1184_v36 = vpop.f32.mrf.mxu0  ;;  %v1188_v37 = vmax.f32 %v1180_v22, %v1186_v30  ;;  %v5510_v22 = vld [vmem:[#allocation4 + $0x374] ss:$8 sps:$4 sm:$0xff]   ;;  %v5517_v33 = vld [vmem:[#allocation4 + $0x340] ss:$8 sps:$4 sm:$0xff]  }
 0x39c   :  { %v5516_v30 = vld [vmem:[#allocation4 + $0x354] ss:$8 sps:$4 sm:$0xff]   ;;  %v5520_v36 = vld [vmem:[#allocation4 + $0x330] ss:$8 sps:$4 sm:$0xff]  }
 0x39d   :  { %v1189_v38 = vmax.f32 %v1182_v31, %v1187_v35  ;;  %v1223_v40 = vpack.c.bf16 %v1188_v37, %v1188_v37  ;;  %v5514_v31 = vld [vmem:[#allocation4 + $0x350] ss:$8 sps:$4 sm:$0xff]   ;;  %v5522_v35 = vld [vmem:[#allocation4 + $0x334] ss:$8 sps:$4 sm:$0xff]   ;;  %v1379_v37 = vld [vmem:[#allocation10 + $0x5] ss:$0 sm:$0xff] }
 0x39f   :  { %v1224_v39 = vpack.c.bf16 %v1189_v38, %v1189_v38 }
 0x3a1   :  { %1353 = vmatprep.mubr.bf16.mxu0 %v1224_v39 }
 0x3a2   :  { %1354 = vmatmul.mubr.bf16.vlgmr.msra.gmra.mxu0 %v1223_v40 }
 0x3a3   :  { %1613 = vmatprep.mubr.bf16.mxu0 %v6079_v27  ;;  %1582 = vmatpush1.bf16.msra.mxu0 %v5460_v44 }
 0x3a4   :  { %1583 = vmatprep.subr.bf16.mxu0 %v5465_v46  ;;  %v5525_v46 = vld [vmem:[#allocation4 + $0x324] ss:$8 sps:$4 sm:$0xff]  }
 0x3a7   :  { %1584 = vmatpush1.bf16.msra.mxu0 %v5463_v47  ;;  %v5523_v47 = vld [vmem:[#allocation4 + $0x320] ss:$8 sps:$4 sm:$0xff]  }
 0x3a8   :  { %1585 = vmatprep.subr.bf16.mxu0 %v5468_v48  ;;  %v5528_v48 = vld [vmem:[#allocation4 + $0x314] ss:$8 sps:$4 sm:$0xff]  }
 0x3ab   :  { %1586 = vmatpush1.bf16.msra.mxu0 %v5466_v49  ;;  %v5526_v49 = vld [vmem:[#allocation4 + $0x310] ss:$8 sps:$4 sm:$0xff]  }
 0x3ac   :  { %1587 = vmatprep.subr.bf16.mxu0 %v5471_v50  ;;  %v5531_v50 = vld [vmem:[#allocation4 + $0x304] ss:$8 sps:$4 sm:$0xff]  }
 0x3af   :  { %1588 = vmatpush1.bf16.msra.mxu0 %v5469_v51  ;;  %v5529_v51 = vld [vmem:[#allocation4 + $0x300] ss:$8 sps:$4 sm:$0xff]  }
 0x3b0   :  { %1589 = vmatprep.subr.bf16.mxu0 %v5474_v52  ;;  %v5532_v52 = vld [vmem:[#allocation2 + $0x178] sm:$0xff]  }
 0x3b3   :  { %1590 = vmatpush1.bf16.msra.mxu0 %v5472_v0  ;;  %v5533_v0 = vld [vmem:[#allocation2 + $0x138] sm:$0xff]  }
 0x3b4   :  { %1591 = vmatprep.subr.bf16.mxu0 %v5477_v53  ;;  %v5534_v53 = vld [vmem:[#allocation2 + $0x170] sm:$0xff]  }
 0x3b7   :  { %1592 = vmatpush1.bf16.msra.mxu0 %v5475_v54  ;;  %v5535_v54 = vld [vmem:[#allocation2 + $0x130] sm:$0xff]  }
 0x3b8   :  { %1593 = vmatprep.subr.bf16.mxu0 %v5480_v2 }
 0x3bb   :  { %1594 = vmatpush1.bf16.msra.mxu0 %v5478_v3 }
 0x3bc   :  { %1595 = vmatprep.subr.bf16.mxu0 %v5483_v4 }
 0x3bf   :  { %1596 = vmatpush1.bf16.msra.mxu0 %v5481_v5 }
 0x3c0   :  { %5186 = vmatprep.subr.bf16.mxu0 %v5532_v52 }
 0x462   :  { %v5171_v55 = vpop.f32.mrf.mxu0 }
 0x464   :  { %v5172_v57 = vpop.f32.mrf.mxu0 }
 0x465   :  { %v5173_v58 = vadd.f32 %v5172_v57, %v5171_v55  ;;  %v5536_v55 = vld [vmem:[#allocation2 + $0x168] sm:$0xff]   ;;  %v5538_v57 = vld [vmem:[#allocation2 + $0x160] sm:$0xff]  }
 0x466   :  { %v5174_v59 = vpop.f32.mrf.mxu0 }
 0x467   :  { %v1356_v60 = vadd.f32 %v5173_v58, %v1222_v56  ;;  %v5537_v56 = vld [vmem:[#allocation2 + $0x128] sm:$0xff]   ;;  %v5539_v58 = vld [vmem:[#allocation2 + $0x120] sm:$0xff]   ;;  %v5540_v59 = vld [vmem:[#allocation2 + $0x158] sm:$0xff]  }
 0x468   :  { %v5175_v61 = vpop.f32.mrf.mxu0 }
 0x469   :  { %v1361_v62 = vmul.f32 0.01, %v1356_v60  ;;  %v1488_v61 = vld [vmem:[#allocation10 + $0x6] ss:$8 sm:$0x3] }
 0x46b   :  { %v1362_v63 = vmax.f32 %v1356_v60, %v1361_v62  ;;  %v5541_v60 = vld [vmem:[#allocation2 + $0x118] sm:$0xff]   ;;  %v1494_v62 = vrot.slane %v1488_v61, %v6158_v26 }
 0x46d   :  { %v1380_v1 = vpack.c.bf16 %v1362_v63, %v1362_v63  ;;  %v1498_v63 = vrot.slane %v1488_v61, %v6161_v29  ;;  %v2103_v61 = vld [vmem:[#allocation9 + $0x1a0] sm:$0xff] }
 0x46f   :  { %5245 = vmatmul.mubr.bf16.vlgmr.msra.gmra.mxu1 %v1380_v1 }
 0x470   :  { %1834 = vmatpush1.bf16.msra.mxu1 %v5484_v6 }
 0x471   :  { %1835 = vmatprep.subr.bf16.mxu1 %v5489_v8 }
 0x474   :  { %1836 = vmatpush1.bf16.msra.mxu1 %v5487_v9 }
 0x475   :  { %1837 = vmatprep.subr.bf16.mxu1 %v5492_v10 }
 0x478   :  { %1838 = vmatpush1.bf16.msra.mxu1 %v5490_v11 }
 0x479   :  { %1839 = vmatprep.subr.bf16.mxu1 %v5495_v12 }
 0x47c   :  { %1840 = vmatpush1.bf16.msra.mxu1 %v5493_v13  ;;  %v5542_v13 = vld [vmem:[#allocation2 + $0x150] sm:$0xff]  }
 0x47d   :  { %1841 = vmatprep.subr.bf16.mxu1 %v5498_v14  ;;  %v5543_v14 = vld [vmem:[#allocation2 + $0x110] sm:$0xff]  }
 0x480   :  { %1842 = vmatpush1.bf16.msra.mxu1 %v5496_v15  ;;  %v5544_v15 = vld [vmem:[#allocation2 + $0x148] sm:$0xff]  }
 0x481   :  { %1843 = vmatprep.subr.bf16.mxu1 %v5501_v16  ;;  %v5545_v16 = vld [vmem:[#allocation2 + $0x108] sm:$0xff]  }
 0x484   :  { %1844 = vmatpush1.bf16.msra.mxu1 %v5499_v17  ;;  %v5546_v17 = vld [vmem:[#allocation2 + $0x140] sm:$0xff]  }
 0x485   :  { %1845 = vmatprep.subr.bf16.mxu1 %v5504_v18  ;;  %v5547_v18 = vld [vmem:[#allocation2 + $0x100] sm:$0xff]  }
 0x488   :  { %1846 = vmatpush1.bf16.msra.mxu1 %v5502_v19  ;;  %v2107_v19 = vld [vmem:[#allocation9 + $0x1c0] sm:$0xff] }
 0x489   :  { %1847 = vmatprep.subr.bf16.mxu1 %v5507_v20  ;;  %v2111_v20 = vld [vmem:[#allocation9 + $0x1e0] sm:$0xff] }
 0x48c   :  { %1848 = vmatpush1.bf16.msra.mxu1 %v5505_v21  ;;  %v2108_v21 = vld [vmem:[#allocation9 + $0x1c8] sm:$0xff] }
 0x48d   :  { %1849 = vmatprep.subr.bf16.mxu1 %v5510_v22  ;;  %v4860_v22 = vcombine.low %v2107_v19, %v2111_v20 }
 0x490   :  { %1850 = vmatpush2.bf16.msra.mxu1 %v5508_v23  ;;  %v4861_v23 = vcombine.high %v2107_v19, %v2111_v20  ;;  %v2072_v19 = vld [vmem:[#allocation9 + $0xa8] sm:$0xff] }
 0x491   :  { %1851 = vmatprep.subr.bf16.mxu1 %v5513_v24  ;;  %v2112_v24 = vld [vmem:[#allocation9 + $0x1e8] sm:$0xff] }
 0x494   :  { %1852 = vmatpush2.bf16.msra.mxu1 %v5511_v28  ;;  %v4862_v28 = vcombine.low %v2108_v21, %v2112_v24 }
 0x495   :  { %1853 = vmatprep.subr.bf16.mxu1 %v5516_v30  ;;  %v4863_v30 = vcombine.high %v2108_v21, %v2112_v24  ;;  %v2063_v24 = vld [vmem:[#allocation9 + $0x60] sm:$0xff] }
 0x498   :  { %1854 = vmatpush2.bf16.msra.mxu1 %v5514_v31  ;;  %v2100_v31 = vld [vmem:[#allocation9 + $0x188] sm:$0xff] }
 0x499   :  { %1855 = vmatprep.subr.bf16.mxu1 %v5519_v32  ;;  %v2104_v32 = vld [vmem:[#allocation9 + $0x1a8] sm:$0xff] }
 0x49c   :  { %1856 = vmatpush2.bf16.msra.mxu1 %v5517_v33  ;;  %v4855_v33 = vcombine.high %v2100_v31, %v2104_v32 }
 0x49d   :  { %1857 = vmatprep.subr.bf16.mxu1 %v5522_v35  ;;  %v4854_v35 = vcombine.low %v2100_v31, %v2104_v32  ;;  %v2064_v31 = vld [vmem:[#allocation9 + $0x68] sm:$0xff] }
 0x4a0   :  { %1858 = vmatpush2.bf16.msra.mxu1 %v5520_v36  ;;  %v2092_v36 = vld [vmem:[#allocation9 + $0x148] sm:$0xff] }
 0x4a1   :  { %1859 = vmatprep.subr.bf16.mxu1 %v5525_v46 }
 0x4a4   :  { %1860 = vmatpush2.bf16.msra.mxu1 %v5523_v47 }
 0x4a5   :  { %1861 = vmatprep.subr.bf16.mxu1 %v5528_v48  ;;  %v1659_v48 = vld [vmem:[#allocation10 + $0x7] ss:$8 sm:$0x3] }
 0x4a8   :  { %1862 = vmatpush2.bf16.msra.mxu1 %v5526_v49  ;;  %v1666_v49 = vrot.slane %v1659_v48, %v6158_v26 }
 0x4a9   :  { %1863 = vmatprep.subr.bf16.mxu1 %v5531_v50  ;;  %v1670_v50 = vrot.slane %v1659_v48, %v6161_v29  ;;  %v2114_v48 = vld [vmem:[#allocation9 + $0x1f8] sm:$0xff] }
 0x4ac   :  { %1864 = vmatpush2.bf16.msra.mxu1 %v5529_v51 }
 0x4ad   :  { %2522 = vmatprep.subr.bf16.mxu1 %v4863_v30 }
 0x52f   :  { %v1463_v38 = vpop.f32.mrf.mxu1 }
 0x530   :  { %v1464_v39 = vadd.f32 %v1463_v38, %v1379_v37  ;;  %v2096_v37 = vld [vmem:[#allocation9 + $0x168] sm:$0xff] }
 0x531   :  { %v5246_v40 = vpop.f32.mrf.mxu1  ;;  %v4847_v38 = vcombine.high %v2092_v36, %v2096_v37 }
 0x532   :  { %v1469_v41 = vmul.f32 0.01, %v1464_v39  ;;  %v2084_v40 = vld [vmem:[#allocation9 + $0x108] sm:$0xff] }
 0x533   :  { %v1466_v42 = vpop.f32.mrf.mxu1 }
 0x534   :  { %v1470_v43 = vmax.f32 %v1464_v39, %v1469_v41  ;;  %v4846_v39 = vcombine.low %v2092_v36, %v2096_v37  ;;  %v2088_v41 = vld [vmem:[#allocation9 + $0x128] sm:$0xff]  ;;  %v2051_v36 = vld [vmem:[#allocation9] sm:$0xff] }
 0x535   :  { %v5247_v44 = vpop.f32.mrf.mxu1  ;;  %v4839_v42 = vcombine.high %v2084_v40, %v2088_v41  ;;  %v2055_v37 = vld [vmem:[#allocation9 + $0x20] sm:$0xff] }
 0x536   :  { %v1489_v45 = vpack.c.bf16 %v1470_v43, %v1470_v43  ;;  %v4838_v43 = vcombine.low %v2084_v40, %v2088_v41  ;;  %v2076_v44 = vld [vmem:[#allocation9 + $0xc8] sm:$0xff]  ;;  %v4804_v41 = vcombine.low %v2051_v36, %v2055_v37 }
 0x537   :  { %v2056_v40 = vld [vmem:[#allocation9 + $0x28] sm:$0xff] }
 0x538   :  { %1614 = vmatmul.mubr.bf16.vlgmr.msra.gmra.mxu0 %v1489_v45  ;;  %v2080_v45 = vld [vmem:[#allocation9 + $0xe8] sm:$0xff] }
 0x539   :  { %5187 = vmatpush3.bf16.msra.mxu0 %v5533_v0  ;;  %v4831_v46 = vcombine.high %v2076_v44, %v2080_v45  ;;  %v4830_v47 = vcombine.low %v2076_v44, %v2080_v45  ;;  %v2109_v44 = vld [vmem:[#allocation9 + $0x1d0] sm:$0xff] }
 0x53a   :  { %5188 = vmatprep.subr.bf16.mxu0 %v5534_v53  ;;  %v2113_v45 = vld [vmem:[#allocation9 + $0x1f0] sm:$0xff] }
 0x53d   :  { %5189 = vmatpush3.bf16.msra.mxu0 %v5535_v54 }
 0x53e   :  { %5190 = vmatprep.subr.bf16.mxu0 %v5536_v55 }
 0x541   :  { %5191 = vmatpush3.bf16.msra.mxu0 %v5537_v56 }
 0x542   :  { %5192 = vmatprep.subr.bf16.mxu0 %v5538_v57 }
 0x545   :  { %5193 = vmatpush3.bf16.msra.mxu0 %v5539_v58 }
 0x546   :  { %5194 = vmatprep.subr.bf16.mxu0 %v5540_v59 }
 0x549   :  { %5195 = vmatpush3.bf16.msra.mxu0 %v5541_v60  ;;  %v2099_v60 = vld [vmem:[#allocation9 + $0x180] sm:$0xff] }
 0x54a   :  { %5196 = vmatprep.subr.bf16.mxu0 %v5542_v13 }
 0x54d   :  { %5197 = vmatpush3.bf16.msra.mxu0 %v5543_v14 }
 0x54e   :  { %5198 = vmatprep.subr.bf16.mxu0 %v5544_v15  ;;  %v2067_v15 = vld [vmem:[#allocation9 + $0x80] sm:$0xff] }
 0x551   :  { %5199 = vmatpush3.bf16.msra.mxu0 %v5545_v16  ;;  %v2071_v16 = vld [vmem:[#allocation9 + $0xa0] sm:$0xff] }
 0x552   :  { %5200 = vmatprep.subr.bf16.mxu0 %v5546_v17  ;;  %v2068_v17 = vld [vmem:[#allocation9 + $0x88] sm:$0xff]  ;;  %v4820_v20 = vcombine.low %v2067_v15, %v2071_v16 }
 0x553   :  { %v4822_v21 = vcombine.low %v2068_v17, %v2072_v19 }
 0x555   :  { %5201 = vmatpush3.bf16.msra.mxu0 %v5547_v18  ;;  %v4821_v18 = vcombine.high %v2067_v15, %v2071_v16  ;;  %v2090_v15 = vld [vmem:[#allocation9 + $0x138] sm:$0xff] }
 0x556   :  { %2481 = vmatprep.subr.bf16.mxu0 %v4861_v23  ;;  %v2059_v23 = vld [vmem:[#allocation9 + $0x40] sm:$0xff] }
 0x557   :  { %v4813_v30 = vcombine.high %v2059_v23, %v2063_v24  ;;  %v4812_v32 = vcombine.low %v2059_v23, %v2063_v24  ;;  %v2082_v23 = vld [vmem:[#allocation9 + $0xf8] sm:$0xff] }
 0x5f8   :  { %v1615_v1 = vpop.f32.mrf.mxu0 }
 0x5f9   :  { %v1616_v2 = vadd.f32 %v1615_v1, %v1494_v62  ;;  %v4853_v1 = vcombine.high %v2099_v60, %v2103_v61 }
 0x5fa   :  { %v1617_v3 = vpop.f32.mrf.mxu0 }
 0x5fb   :  { %v1622_v4 = vmul.f32 0.01, %v1616_v2  ;;  %v1618_v5 = vadd.f32 %v1617_v3, %v1498_v63  ;;  %v2095_v3 = vld [vmem:[#allocation9 + $0x160] sm:$0xff] }
 0x5fc   :  { %v1619_v6 = vpop.f32.mrf.mxu0 }
 0x5fd   :  { %v1623_v7 = vmul.f32 0.01, %v1618_v5  ;;  %v1624_v8 = vmax.f32 %v1616_v2, %v1622_v4  ;;  %v2091_v2 = vld [vmem:[#allocation9 + $0x140] sm:$0xff]  ;;  %v4852_v4 = vcombine.low %v2099_v60, %v2103_v61  ;;  %v2105_v60 = vld [vmem:[#allocation9 + $0x1b0] sm:$0xff]  ;;  %v2102_v61 = vld [vmem:[#allocation9 + $0x198] sm:$0xff] }
 0x5fe   :  { %v1620_v9 = vpop.f32.mrf.mxu0  ;;  %v2083_v6 = vld [vmem:[#allocation9 + $0x100] sm:$0xff] }
 0x5ff   :  { %v1625_v10 = vmax.f32 %v1618_v5, %v1623_v7  ;;  %v1660_v12 = vpack.c.bf16 %v1624_v8, %v1624_v8  ;;  %v4845_v5 = vcombine.high %v2091_v2, %v2095_v3  ;;  %v2087_v7 = vld [vmem:[#allocation9 + $0x120] sm:$0xff]  ;;  %v4844_v8 = vcombine.low %v2091_v2, %v2095_v3 }
 0x600   :  { %v4837_v9 = vcombine.high %v2083_v6, %v2087_v7 }
 0x601   :  { %v1661_v11 = vpack.c.bf16 %v1625_v10, %v1625_v10  ;;  %v2075_v10 = vld [vmem:[#allocation9 + $0xc0] sm:$0xff] }
 0x603   :  { %1865 = vmatprep.mubr.bf16.mxu1 %v1661_v11  ;;  %v2079_v11 = vld [vmem:[#allocation9 + $0xe0] sm:$0xff] }
 0x604   :  { %1866 = vmatmul.mubr.bf16.vlgmr.msra.gmra.mxu1 %v1660_v12  ;;  %v4836_v12 = vcombine.low %v2083_v6, %v2087_v7  ;;  %v4829_v13 = vcombine.high %v2075_v10, %v2079_v11  ;;  %v4828_v14 = vcombine.low %v2075_v10, %v2079_v11  ;;  %v2094_v6 = vld [vmem:[#allocation9 + $0x158] sm:$0xff] }
 0x605   :  { %2554 = vmatprep.mubr.bf16.mxu1 %v6079_v27  ;;  %2523 = vmatpush1.bf16.msra.mxu1 %v4862_v28  ;;  %v2060_v28 = vld [vmem:[#allocation9 + $0x48] sm:$0xff]  ;;  %v2098_v7 = vld [vmem:[#allocation9 + $0x178] sm:$0xff] }
 0x606   :  { %2524 = vmatprep.subr.bf16.mxu1 %v4855_v33  ;;  %v4814_v33 = vcombine.low %v2060_v28, %v2064_v31  ;;  %v4851_v11 = vcombine.high %v2094_v6, %v2098_v7 }
 0x609   :  { %2525 = vmatpush1.bf16.msra.mxu1 %v4854_v35  ;;  %v4815_v35 = vcombine.high %v2060_v28, %v2064_v31  ;;  %v2069_v31 = vld [vmem:[#allocation9 + $0x90] sm:$0xff] }
 0x60a   :  { %2526 = vmatprep.subr.bf16.mxu1 %v4847_v38  ;;  %v2052_v38 = vld [vmem:[#allocation9 + $0x8] sm:$0xff] }
 0x60d   :  { %2527 = vmatpush1.bf16.msra.mxu1 %v4846_v39  ;;  %v4805_v39 = vcombine.high %v2051_v36, %v2055_v37 }
 0x60e   :  { %2528 = vmatprep.subr.bf16.mxu1 %v4839_v42  ;;  %v4806_v42 = vcombine.low %v2052_v38, %v2056_v40 }
 0x611   :  { %2529 = vmatpush1.bf16.msra.mxu1 %v4838_v43  ;;  %v4807_v43 = vcombine.high %v2052_v38, %v2056_v40  ;;  %v2061_v40 = vld [vmem:[#allocation9 + $0x50] sm:$0xff] }
 0x612   :  { %2530 = vmatprep.subr.bf16.mxu1 %v4831_v46  ;;  %v2110_v46 = vld [vmem:[#allocation9 + $0x1d8] sm:$0xff] }
 0x615   :  { %2531 = vmatpush1.bf16.msra.mxu1 %v4830_v47  ;;  %v4865_v47 = vcombine.high %v2109_v44, %v2113_v45 }
 0x6c4   :  { %v1867_v51 = vpop.f32.mrf.mxu1 }
 0x6c5   :  { %v1868_v52 = vadd.f32 %v1867_v51, %v1666_v49  ;;  %v4864_v49 = vcombine.low %v2109_v44, %v2113_v45  ;;  %v4867_v51 = vcombine.high %v2110_v46, %v2114_v48 }
 0x6c6   :  { %v1869_v0 = vpop.f32.mrf.mxu1 }
 0x6c7   :  { %v1874_v53 = vmul.f32 0.01, %v1868_v52  ;;  %v1870_v54 = vadd.f32 %v1869_v0, %v1670_v50  ;;  %v4866_v50 = vcombine.low %v2110_v46, %v2114_v48  ;;  %v1910_v0 = vld [vmem:[#allocation10 + $0x40] ss:$0 sm:$0xff]  ;;  %v2053_v48 = vld [vmem:[#allocation9 + $0x10] sm:$0xff] }
 0x6c8   :  { %v1871_v55 = vpop.f32.mrf.mxu1 }
 0x6c9   :  { %v1875_v56 = vmul.f32 0.01, %v1870_v54  ;;  %v1876_v57 = vmax.f32 %v1868_v52, %v1874_v53 }
 0x6ca   :  { %v1872_v58 = vpop.f32.mrf.mxu1 }
 0x6cb   :  { %v1877_v59 = vmax.f32 %v1870_v54, %v1875_v56  ;;  %v1911_v63 = vpack.c.bf16 %v1876_v57, %v1876_v57 }
 0x6cd   :  { %v1912_v62 = vpack.c.bf16 %v1877_v59, %v1877_v59  ;;  %v2101_v59 = vld [vmem:[#allocation9 + $0x190] sm:$0xff] }
 0x6ce   :  { %v4857_v2 = vcombine.high %v2101_v59, %v2105_v60 }
 0x6cf   :  { %2041 = vmatprep.mubr.bf16.mxu0 %v1912_v62  ;;  %v2106_v62 = vld [vmem:[#allocation9 + $0x1b8] sm:$0xff] }
 0x6d0   :  { %2042 = vmatmul.mubr.bf16.vlgmr.msra.gmra.mxu0 %v1911_v63  ;;  %v4859_v3 = vcombine.high %v2102_v61, %v2106_v62 }
 0x6d1   :  { %2482 = vmatpush1.bf16.msra.mxu0 %v4860_v22  ;;  %2513 = vmatprep.mubr.bf16.mxu0 %v6079_v27  ;;  %v4823_v22 = vcombine.high %v2068_v17, %v2072_v19  ;;  %v4850_v17 = vcombine.low %v2094_v6, %v2098_v7  ;;  %v5563_v6 = vld [vmem:[#allocation7 + $0x2a0] ss:$16 sps:$4 sm:$0xff]   ;;  %v5568_v7 = vld [vmem:[#allocation7 + $0x84] ss:$16 sps:$4 sm:$0xff]  }
 0x6d2   :  { %2483 = vmatprep.subr.bf16.mxu0 %v4853_v1 }
 0x6d3   :  { %2532 = vmatprep.subr.bf16.mxu1 %v4823_v22  ;;  %v2078_v22 = vld [vmem:[#allocation9 + $0xd8] sm:$0xff] }
 0x6d4   :  { %2533 = vmatpush1.bf16.msra.mxu1 %v4822_v21  ;;  %v2081_v21 = vld [vmem:[#allocation9 + $0xf0] sm:$0xff]  ;;  %v4834_v37 = vcombine.low %v2078_v22, %v2082_v23 }
 0x6d5   :  { %2484 = vmatpush1.bf16.msra.mxu0 %v4852_v4  ;;  %2534 = vmatprep.subr.bf16.mxu1 %v4815_v35  ;;  %v2093_v4 = vld [vmem:[#allocation9 + $0x150] sm:$0xff]  ;;  %v2074_v35 = vld [vmem:[#allocation9 + $0xb8] sm:$0xff] }
 0x6d6   :  { %2485 = vmatprep.subr.bf16.mxu0 %v4845_v5  ;;  %v2097_v5 = vld [vmem:[#allocation9 + $0x170] sm:$0xff] }
 0x6d7   :  { %v4849_v10 = vcombine.high %v2093_v4, %v2097_v5  ;;  %v4848_v16 = vcombine.low %v2093_v4, %v2097_v5  ;;  %v5565_v4 = vld [vmem:[#allocation7 + $0x2a4] ss:$16 sps:$4 sm:$0xff]   ;;  %v5560_v5 = vld [vmem:[#allocation7 + $0xa0] ss:$16 sps:$4 sm:$0xff]  }
 0x6d8   :  { %2535 = vmatpush1.bf16.msra.mxu1 %v4814_v33  ;;  %v2070_v33 = vld [vmem:[#allocation9 + $0x98] sm:$0xff] }
 0x6d9   :  { %2486 = vmatpush1.bf16.msra.mxu0 %v4844_v8  ;;  %2536 = vmatprep.subr.bf16.mxu1 %v4807_v43  ;;  %v4856_v8 = vcombine.low %v2101_v59, %v2105_v60  ;;  %v2066_v43 = vld [vmem:[#allocation9 + $0x78] sm:$0xff]  ;;  %v4826_v45 = vcombine.low %v2070_v33, %v2074_v35  ;;  %v5548_v59 = vld [vmem:[#allocation7 + $0xe0] ss:$16 sps:$4 sm:$0xff]  }
 0x6da   :  { %2487 = vmatprep.subr.bf16.mxu0 %v4837_v9  ;;  %v4858_v9 = vcombine.low %v2102_v61, %v2106_v62  ;;  %v5551_v60 = vld [vmem:[#allocation7 + $0x2e0] ss:$16 sps:$4 sm:$0xff]   ;;  %v5556_v61 = vld [vmem:[#allocation7 + $0xc4] ss:$16 sps:$4 sm:$0xff]  }
 0x6db   :  { %v5559_v62 = vld [vmem:[#allocation7 + $0x2c4] ss:$16 sps:$4 sm:$0xff]  }
 0x6dc   :  { %2537 = vmatpush1.bf16.msra.mxu1 %v4806_v42  ;;  %v2062_v42 = vld [vmem:[#allocation9 + $0x58] sm:$0xff] }
 0x6dd   :  { %2488 = vmatpush1.bf16.msra.mxu0 %v4836_v12  ;;  %2604 = vmatprep.subr.bf16.mxu1 %v4867_v51  ;;  %v2085_v12 = vld [vmem:[#allocation9 + $0x110] sm:$0xff]  ;;  %v2058_v51 = vld [vmem:[#allocation9 + $0x38] sm:$0xff] }
 0x6de   :  { %2489 = vmatprep.subr.bf16.mxu0 %v4829_v13  ;;  %v2089_v13 = vld [vmem:[#allocation9 + $0x130] sm:$0xff] }
 0x6df   :  { %v4840_v24 = vcombine.low %v2085_v12, %v2089_v13 }
 0x6e1   :  { %2490 = vmatpush1.bf16.msra.mxu0 %v4828_v14  ;;  %v2086_v14 = vld [vmem:[#allocation9 + $0x118] sm:$0xff] }
 0x6e2   :  { %2491 = vmatprep.subr.bf16.mxu0 %v4821_v18  ;;  %v4841_v18 = vcombine.high %v2085_v12, %v2089_v13  ;;  %v4843_v19 = vcombine.high %v2086_v14, %v2090_v15  ;;  %v4842_v28 = vcombine.low %v2086_v14, %v2090_v15  ;;  %v5572_v12 = vld [vmem:[#allocation7 + $0x60] ss:$16 sps:$4 sm:$0xff]   ;;  %v5580_v14 = vld [vmem:[#allocation7 + $0x44] ss:$16 sps:$4 sm:$0xff]  }
 0x6e3   :  { %v5575_v13 = vld [vmem:[#allocation7 + $0x260] ss:$16 sps:$4 sm:$0xff]   ;;  %v5583_v15 = vld [vmem:[#allocation7 + $0x244] ss:$16 sps:$4 sm:$0xff]  }
 0x6e5   :  { %2492 = vmatpush1.bf16.msra.mxu0 %v4820_v20  ;;  %v2077_v20 = vld [vmem:[#allocation9 + $0xd0] sm:$0xff] }
 0x6e6   :  { %2493 = vmatprep.subr.bf16.mxu0 %v4813_v30  ;;  %v4833_v30 = vcombine.high %v2077_v20, %v2081_v21  ;;  %v4832_v36 = vcombine.low %v2077_v20, %v2081_v21  ;;  %v5584_v20 = vld [vmem:[#allocation7 + $0x20] ss:$16 sps:$4 sm:$0xff]  }
 0x6e7   :  { %v5587_v21 = vld [vmem:[#allocation7 + $0x220] ss:$16 sps:$4 sm:$0xff]  }
 0x6e9   :  { %2494 = vmatpush1.bf16.msra.mxu0 %v4812_v32  ;;  %v2073_v32 = vld [vmem:[#allocation9 + $0xb0] sm:$0xff] }
 0x6ea   :  { %2495 = vmatprep.subr.bf16.mxu0 %v4805_v39  ;;  %v4825_v38 = vcombine.high %v2069_v31, %v2073_v32  ;;  %v4827_v39 = vcombine.high %v2070_v33, %v2074_v35  ;;  %v4824_v44 = vcombine.low %v2069_v31, %v2073_v32  ;;  %v5596_v31 = vld [vmem:[#allocation7 + $0x1e0] ss:$16 sps:$4 sm:$0xff]   ;;  %v5604_v33 = vld [vmem:[#allocation7 + $0x1c4] ss:$16 sps:$4 sm:$0xff]  }
 0x6eb   :  { %v5599_v32 = vld [vmem:[#allocation7 + $0x3e0] ss:$16 sps:$4 sm:$0xff]   ;;  %v5607_v35 = vld [vmem:[#allocation7 + $0x3c4] ss:$16 sps:$4 sm:$0xff]  }
 0x6ed   :  { %2496 = vmatpush1.bf16.msra.mxu0 %v4804_v41  ;;  %v2065_v41 = vld [vmem:[#allocation9 + $0x70] sm:$0xff] }
 0x6ee   :  { %2563 = vmatprep.subr.bf16.mxu0 %v4865_v47  ;;  %v4817_v46 = vcombine.high %v2061_v40, %v2065_v41  ;;  %v4819_v47 = vcombine.high %v2062_v42, %v2066_v43 }
 0x790   :  { %v5202_v52 = vpop.f32.mrf.mxu0 }
 0x792   :  { %v5203_v53 = vpop.f32.mrf.mxu0 }
 0x793   :  { %v5204_v54 = vadd.f32 %v5203_v53, %v5202_v52  ;;  %v4816_v52 = vcombine.low %v2061_v40, %v2065_v41  ;;  %v5608_v40 = vld [vmem:[#allocation7 + $0x1a0] ss:$16 sps:$4 sm:$0xff]  }
 0x794   :  { %v5205_v55 = vpop.f32.mrf.mxu0  ;;  %v5611_v41 = vld [vmem:[#allocation7 + $0x3a0] ss:$16 sps:$4 sm:$0xff]  }
 0x795   :  { %v2044_v56 = vadd.f32 %v5204_v54, %v1910_v0  ;;  %v4818_v0 = vcombine.low %v2062_v42, %v2066_v43  ;;  %v5616_v42 = vld [vmem:[#allocation7 + $0x184] ss:$16 sps:$4 sm:$0xff]  }
 0x796   :  { %v5206_v57 = vpop.f32.mrf.mxu0  ;;  %v5619_v43 = vld [vmem:[#allocation7 + $0x384] ss:$16 sps:$4 sm:$0xff]  }
 0x797   :  { %v2049_v58 = vmul.f32 0.01, %v2044_v56  ;;  %v5550_v57 = vld [vmem:[#allocation7 + $0xe4] ss:$16 sps:$4 sm:$0xff]  }
 0x799   :  { %v2050_v63 = vmax.f32 %v2044_v56, %v2049_v58  ;;  %v5553_v58 = vld [vmem:[#allocation7 + $0x2e4] ss:$16 sps:$4 sm:$0xff]  }
 0x79b   :  { %v6191_v1 = vpack.c.bf16 %v2050_v63, %v2050_v63  ;;  %v5554_v63 = vld [vmem:[#allocation7 + $0xc0] ss:$16 sps:$4 sm:$0xff]  }
 0x79d   :  { %2514 = vmatmul.mubr.bf16.vlgmr.msra.gmra.mxu0 %v6191_v1  ;;  %2555 = vmatmul.mubr.bf16.vlgmr.msra.gmra.mxu1 %v6191_v1 }
 0x79e   :  { %2564 = vmatpush1.bf16.msra.mxu0 %v4864_v49  ;;  %2605 = vmatpush1.bf16.msra.mxu1 %v4866_v50  ;;  %v2057_v49 = vld [vmem:[#allocation9 + $0x30] sm:$0xff]  ;;  %v2054_v50 = vld [vmem:[#allocation9 + $0x18] sm:$0xff] }
 0x79f   :  { %2565 = vmatprep.subr.bf16.mxu0 %v4857_v2  ;;  %2606 = vmatprep.subr.bf16.mxu1 %v4859_v3  ;;  %v4809_v53 = vcombine.high %v2053_v48, %v2057_v49  ;;  %v4811_v54 = vcombine.high %v2054_v50, %v2058_v51  ;;  %v4808_v55 = vcombine.low %v2053_v48, %v2057_v49  ;;  %v5557_v2 = vld [vmem:[#allocation7 + $0x2c0] ss:$16 sps:$4 sm:$0xff]   ;;  %v5562_v3 = vld [vmem:[#allocation7 + $0xa4] ss:$16 sps:$4 sm:$0xff]  }
 0x7a0   :  { %2595 = vmatprep.mubr.bf16.mxu0 %v6079_v27  ;;  %2636 = vmatprep.mubr.bf16.mxu1 %v6079_v27  ;;  %v4835_v27 = vcombine.high %v2078_v22, %v2082_v23  ;;  %v4810_v56 = vcombine.low %v2054_v50, %v2058_v51  ;;  %v5592_v22 = vld [vmem:[#allocation7 + $0x4] ss:$16 sps:$4 sm:$0xff]   ;;  %v5620_v48 = vld [vmem:[#allocation7 + $0x160] ss:$16 sps:$4 sm:$0xff]  }
 0x7a1   :  { %v5595_v23 = vld [vmem:[#allocation7 + $0x204] ss:$16 sps:$4 sm:$0xff]   ;;  %v5623_v49 = vld [vmem:[#allocation7 + $0x360] ss:$16 sps:$4 sm:$0xff]  }
 0x7a2   :  { %2566 = vmatpush1.bf16.msra.mxu0 %v4856_v8  ;;  %2607 = vmatpush1.bf16.msra.mxu1 %v4858_v9  ;;  %v5571_v8 = vld [vmem:[#allocation7 + $0x284] ss:$16 sps:$4 sm:$0xff]   ;;  %v5566_v9 = vld [vmem:[#allocation7 + $0x80] ss:$16 sps:$4 sm:$0xff]  }
 0x7a3   :  { %2567 = vmatprep.subr.bf16.mxu0 %v4849_v10  ;;  %2608 = vmatprep.subr.bf16.mxu1 %v4851_v11  ;;  %v5574_v10 = vld [vmem:[#allocation7 + $0x64] ss:$16 sps:$4 sm:$0xff]  }
 0x7a4   :  { %v5577_v11 = vld [vmem:[#allocation7 + $0x264] ss:$16 sps:$4 sm:$0xff]  }
 0x7a5   :  { %v5628_v50 = vld [vmem:[#allocation7 + $0x144] ss:$16 sps:$4 sm:$0xff]  }
 0x7a6   :  { %2568 = vmatpush1.bf16.msra.mxu0 %v4848_v16  ;;  %2609 = vmatpush1.bf16.msra.mxu1 %v4850_v17  ;;  %v5578_v16 = vld [vmem:[#allocation7 + $0x40] ss:$16 sps:$4 sm:$0xff]   ;;  %v5631_v51 = vld [vmem:[#allocation7 + $0x344] ss:$16 sps:$4 sm:$0xff]  }
 0x7a7   :  { %2569 = vmatprep.subr.bf16.mxu0 %v4841_v18  ;;  %2610 = vmatprep.subr.bf16.mxu1 %v4843_v19  ;;  %v5581_v17 = vld [vmem:[#allocation7 + $0x240] ss:$16 sps:$4 sm:$0xff]   ;;  %v5586_v18 = vld [vmem:[#allocation7 + $0x24] ss:$16 sps:$4 sm:$0xff]  }
 0x7a8   :  { %v5589_v19 = vld [vmem:[#allocation7 + $0x224] ss:$16 sps:$4 sm:$0xff]  }
 0x7aa   :  { %2570 = vmatpush1.bf16.msra.mxu0 %v4840_v24  ;;  %2611 = vmatpush1.bf16.msra.mxu1 %v4842_v28  ;;  %v5590_v24 = vld [vmem:[#allocation7] ss:$16 sps:$4 sm:$0xff]  }
 0x7ab   :  { %2571 = vmatprep.subr.bf16.mxu0 %v4833_v30  ;;  %2612 = vmatprep.subr.bf16.mxu1 %v4835_v27  ;;  %v5593_v28 = vld [vmem:[#allocation7 + $0x200] ss:$16 sps:$4 sm:$0xff]   ;;  %v5598_v30 = vld [vmem:[#allocation7 + $0x1e4] ss:$16 sps:$4 sm:$0xff]  }
 0x7ac   :  { %v5601_v27 = vld [vmem:[#allocation7 + $0x3e4] ss:$16 sps:$4 sm:$0xff]  }
 0x7ae   :  { %2572 = vmatpush1.bf16.msra.mxu0 %v4832_v36  ;;  %2613 = vmatpush1.bf16.msra.mxu1 %v4834_v37  ;;  %v5602_v36 = vld [vmem:[#allocation7 + $0x1c0] ss:$16 sps:$4 sm:$0xff]  }
 0x7af   :  { %2573 = vmatprep.subr.bf16.mxu0 %v4825_v38  ;;  %2614 = vmatprep.subr.bf16.mxu1 %v4827_v39  ;;  %v5605_v37 = vld [vmem:[#allocation7 + $0x3c0] ss:$16 sps:$4 sm:$0xff]   ;;  %v5610_v38 = vld [vmem:[#allocation7 + $0x1a4] ss:$16 sps:$4 sm:$0xff]  }
 0x7b0   :  { %v5613_v39 = vld [vmem:[#allocation7 + $0x3a4] ss:$16 sps:$4 sm:$0xff]  }
 0x7b2   :  { %2574 = vmatpush1.bf16.msra.mxu0 %v4824_v44  ;;  %2615 = vmatpush1.bf16.msra.mxu1 %v4826_v45  ;;  %v5614_v44 = vld [vmem:[#allocation7 + $0x180] ss:$16 sps:$4 sm:$0xff]  }
 0x7b3   :  { %2575 = vmatprep.subr.bf16.mxu0 %v4817_v46  ;;  %2616 = vmatprep.subr.bf16.mxu1 %v4819_v47  ;;  %v5617_v45 = vld [vmem:[#allocation7 + $0x380] ss:$16 sps:$4 sm:$0xff]   ;;  %v5622_v46 = vld [vmem:[#allocation7 + $0x164] ss:$16 sps:$4 sm:$0xff]  }
 0x7b4   :  { %v5625_v47 = vld [vmem:[#allocation7 + $0x364] ss:$16 sps:$4 sm:$0xff]  }
 0x7b6   :  { %2576 = vmatpush1.bf16.msra.mxu0 %v4816_v52  ;;  %2617 = vmatpush1.bf16.msra.mxu1 %v4818_v0  ;;  %v5626_v52 = vld [vmem:[#allocation7 + $0x140] ss:$16 sps:$4 sm:$0xff]  }
 0x7b7   :  { %2577 = vmatprep.subr.bf16.mxu0 %v4809_v53  ;;  %2618 = vmatprep.subr.bf16.mxu1 %v4811_v54  ;;  %v5629_v0 = vld [vmem:[#allocation7 + $0x340] ss:$16 sps:$4 sm:$0xff]   ;;  %v5634_v53 = vld [vmem:[#allocation7 + $0x124] ss:$16 sps:$4 sm:$0xff]  }
 0x7b8   :  { %v5637_v54 = vld [vmem:[#allocation7 + $0x324] ss:$16 sps:$4 sm:$0xff]  }
 0x7ba   :  { %2578 = vmatpush1.bf16.msra.mxu0 %v4808_v55  ;;  %2619 = vmatpush1.bf16.msra.mxu1 %v4810_v56  ;;  %v5632_v55 = vld [vmem:[#allocation7 + $0x120] ss:$16 sps:$4 sm:$0xff]  }
 0x7bb   :  { %4220 = vmatprep.subr.bf16.mxu0 %v5550_v57  ;;  %4261 = vmatprep.subr.bf16.mxu1 %v5553_v58  ;;  %v5635_v56 = vld [vmem:[#allocation7 + $0x320] ss:$16 sps:$4 sm:$0xff]   ;;  %v5640_v57 = vld [vmem:[#allocation7 + $0x104] ss:$16 sps:$4 sm:$0xff]  }
 0x7bc   :  { %v5643_v58 = vld [vmem:[#allocation7 + $0x304] ss:$16 sps:$4 sm:$0xff]  }
 0x7bd   :  { %2596 = vmatmul.mubr.bf16.vlgmr.msra.gmra.mxu0 %v6191_v1  ;;  %2637 = vmatmul.mubr.bf16.vlgmr.msra.gmra.mxu1 %v6191_v1  ;;  %v5569_v1 = vld [vmem:[#allocation7 + $0x280] ss:$16 sps:$4 sm:$0xff]  }
 0x7be   :  { %4221 = vmatpush1.bf16.msra.mxu0 %v5548_v59  ;;  %4262 = vmatpush1.bf16.msra.mxu1 %v5551_v60  ;;  %v5638_v59 = vld [vmem:[#allocation7 + $0x100] ss:$16 sps:$4 sm:$0xff]  }
 0x7bf   :  { %4222 = vmatprep.subr.bf16.mxu0 %v5556_v61  ;;  %4263 = vmatprep.subr.bf16.mxu1 %v5559_v62  ;;  %v5641_v60 = vld [vmem:[#allocation7 + $0x300] ss:$16 sps:$4 sm:$0xff]   ;;  %v5646_v61 = vld [vmem:[#allocation7 + $0x4e4] ss:$16 sps:$4 sm:$0xff]  }
 0x7c0   :  { %v5649_v62 = vld [vmem:[#allocation7 + $0x6e4] ss:$16 sps:$4 sm:$0xff]  }
 0x7c2   :  { %4223 = vmatpush1.bf16.msra.mxu0 %v5554_v63  ;;  %4264 = vmatpush1.bf16.msra.mxu1 %v5557_v2  ;;  %v2116_v63 = vld [vmem:[#allocation10 + $0x41] ss:$8 sm:$0xf] }
 0x7c3   :  { %4224 = vmatprep.subr.bf16.mxu0 %v5562_v3  ;;  %4265 = vmatprep.subr.bf16.mxu1 %v5565_v4  ;;  %v2117_v2 = vld [vmem:[#allocation10 + $0x41] ss:$8 sm:$0xf0]  ;;  %v6202_v4 = vsub.s32 3, %v6155_v25 }
 0x7c4   :  { %v6199_v3 = vor.u32 %v2117_v2, %v2116_v63  ;;  %v5688_v63 = vld [vmem:[#allocation7 + $0x404] ss:$16 sps:$4 sm:$0xff]  }
 0x7c5   :  { %v5691_v2 = vld [vmem:[#allocation7 + $0x604] ss:$16 sps:$4 sm:$0xff]  }
 0x7c6   :  { %4225 = vmatpush1.bf16.msra.mxu0 %v5560_v5  ;;  %4266 = vmatpush1.bf16.msra.mxu1 %v5563_v6  ;;  %v2124_v5 = vrot.slane %v6199_v3, %v6158_v26  ;;  %v2132_v6 = vrot.slane %v6199_v3, %v6169_v34 }
 0x7c7   :  { %4226 = vmatprep.subr.bf16.mxu0 %v5568_v7  ;;  %4267 = vmatprep.subr.bf16.mxu1 %v5571_v8  ;;  %v2128_v7 = vrot.slane %v6199_v3, %v6161_v29  ;;  %v2136_v8 = vrot.slane %v6199_v3, %v6202_v4 }
 0x7ca   :  { %4227 = vmatpush1.bf16.msra.mxu0 %v5566_v9  ;;  %4268 = vmatpush1.bf16.msra.mxu1 %v5569_v1 }
 0x7cb   :  { %4228 = vmatprep.subr.bf16.mxu0 %v5574_v10  ;;  %4269 = vmatprep.subr.bf16.mxu1 %v5577_v11 }
 0x7ce   :  { %4229 = vmatpush1.bf16.msra.mxu0 %v5572_v12  ;;  %4270 = vmatpush1.bf16.msra.mxu1 %v5575_v13 }
 0x7cf   :  { %4230 = vmatprep.subr.bf16.mxu0 %v5580_v14  ;;  %4271 = vmatprep.subr.bf16.mxu1 %v5583_v15 }
 0x7d2   :  { %4231 = vmatpush1.bf16.msra.mxu0 %v5578_v16  ;;  %4272 = vmatpush1.bf16.msra.mxu1 %v5581_v17 }
 0x7d3   :  { %4232 = vmatprep.subr.bf16.mxu0 %v5586_v18  ;;  %4273 = vmatprep.subr.bf16.mxu1 %v5589_v19 }
 0x7d6   :  { %4233 = vmatpush1.bf16.msra.mxu0 %v5584_v20  ;;  %4274 = vmatpush1.bf16.msra.mxu1 %v5587_v21 }
 0x7d7   :  { %4234 = vmatprep.subr.bf16.mxu0 %v5592_v22  ;;  %4275 = vmatprep.subr.bf16.mxu1 %v5595_v23 }
 0x7da   :  { %4235 = vmatpush1.bf16.msra.mxu0 %v5590_v24  ;;  %4276 = vmatpush1.bf16.msra.mxu1 %v5593_v28 }
 0x7db   :  { %4236 = vmatprep.subr.bf16.mxu0 %v5598_v30  ;;  %4277 = vmatprep.subr.bf16.mxu1 %v5601_v27  ;;  %v5644_v30 = vld [vmem:[#allocation7 + $0x4e0] ss:$16 sps:$4 sm:$0xff]  }
 0x7dc   :  { %v5647_v27 = vld [vmem:[#allocation7 + $0x6e0] ss:$16 sps:$4 sm:$0xff]  }
 0x7de   :  { %4237 = vmatpush2.bf16.msra.mxu0 %v5596_v31  ;;  %4278 = vmatpush2.bf16.msra.mxu1 %v5599_v32 }
 0x7df   :  { %4238 = vmatprep.subr.bf16.mxu0 %v5604_v33  ;;  %4279 = vmatprep.subr.bf16.mxu1 %v5607_v35  ;;  %v5652_v33 = vld [vmem:[#allocation7 + $0x4c4] ss:$16 sps:$4 sm:$0xff]  }
 0x7e0   :  { %v5655_v35 = vld [vmem:[#allocation7 + $0x6c4] ss:$16 sps:$4 sm:$0xff]  }
 0x7e2   :  { %4239 = vmatpush2.bf16.msra.mxu0 %v5602_v36  ;;  %4280 = vmatpush2.bf16.msra.mxu1 %v5605_v37  ;;  %v5650_v36 = vld [vmem:[#allocation7 + $0x4c0] ss:$16 sps:$4 sm:$0xff]  }
 0x7e3   :  { %4240 = vmatprep.subr.bf16.mxu0 %v5610_v38  ;;  %4281 = vmatprep.subr.bf16.mxu1 %v5613_v39  ;;  %v5653_v37 = vld [vmem:[#allocation7 + $0x6c0] ss:$16 sps:$4 sm:$0xff]   ;;  %v5658_v38 = vld [vmem:[#allocation7 + $0x4a4] ss:$16 sps:$4 sm:$0xff]  }
 0x7e4   :  { %v5661_v39 = vld [vmem:[#allocation7 + $0x6a4] ss:$16 sps:$4 sm:$0xff]  }
 0x7e6   :  { %4241 = vmatpush2.bf16.msra.mxu0 %v5608_v40  ;;  %4282 = vmatpush2.bf16.msra.mxu1 %v5611_v41  ;;  %v5656_v40 = vld [vmem:[#allocation7 + $0x4a0] ss:$16 sps:$4 sm:$0xff]  }
 0x7e7   :  { %4242 = vmatprep.subr.bf16.mxu0 %v5616_v42  ;;  %4283 = vmatprep.subr.bf16.mxu1 %v5619_v43  ;;  %v5659_v41 = vld [vmem:[#allocation7 + $0x6a0] ss:$16 sps:$4 sm:$0xff]   ;;  %v5664_v42 = vld [vmem:[#allocation7 + $0x484] ss:$16 sps:$4 sm:$0xff]  }
 0x7e8   :  { %v5667_v43 = vld [vmem:[#allocation7 + $0x684] ss:$16 sps:$4 sm:$0xff]  }
 0x7ea   :  { %4243 = vmatpush2.bf16.msra.mxu0 %v5614_v44  ;;  %4284 = vmatpush2.bf16.msra.mxu1 %v5617_v45  ;;  %v5662_v44 = vld [vmem:[#allocation7 + $0x480] ss:$16 sps:$4 sm:$0xff]  }
 0x7eb   :  { %4244 = vmatprep.subr.bf16.mxu0 %v5622_v46  ;;  %4285 = vmatprep.subr.bf16.mxu1 %v5625_v47  ;;  %v5665_v45 = vld [vmem:[#allocation7 + $0x680] ss:$16 sps:$4 sm:$0xff]   ;;  %v5670_v46 = vld [vmem:[#allocation7 + $0x464] ss:$16 sps:$4 sm:$0xff]  }
 0x7ec   :  { %v5673_v47 = vld [vmem:[#allocation7 + $0x664] ss:$16 sps:$4 sm:$0xff]  }
 0x7ee   :  { %4245 = vmatpush2.bf16.msra.mxu0 %v5620_v48  ;;  %4286 = vmatpush2.bf16.msra.mxu1 %v5623_v49  ;;  %v5668_v48 = vld [vmem:[#allocation7 + $0x460] ss:$16 sps:$4 sm:$0xff]  }
 0x7ef   :  { %4246 = vmatprep.subr.bf16.mxu0 %v5628_v50  ;;  %4287 = vmatprep.subr.bf16.mxu1 %v5631_v51  ;;  %v5671_v49 = vld [vmem:[#allocation7 + $0x660] ss:$16 sps:$4 sm:$0xff]   ;;  %v5676_v50 = vld [vmem:[#allocation7 + $0x444] ss:$16 sps:$4 sm:$0xff]  }
 0x7f0   :  { %v5679_v51 = vld [vmem:[#allocation7 + $0x644] ss:$16 sps:$4 sm:$0xff]  }
 0x7f2   :  { %4247 = vmatpush2.bf16.msra.mxu0 %v5626_v52  ;;  %4288 = vmatpush2.bf16.msra.mxu1 %v5629_v0  ;;  %v5674_v52 = vld [vmem:[#allocation7 + $0x440] ss:$16 sps:$4 sm:$0xff]  }
 0x7f3   :  { %4248 = vmatprep.subr.bf16.mxu0 %v5634_v53  ;;  %4289 = vmatprep.subr.bf16.mxu1 %v5637_v54  ;;  %v5677_v0 = vld [vmem:[#allocation7 + $0x640] ss:$16 sps:$4 sm:$0xff]   ;;  %v2143_v53 = vsub.s32 5, %v6155_v25  ;;  %v2151_v54 = vsub.s32 7, %v6155_v25 }
 0x7f6   :  { %4249 = vmatpush2.bf16.msra.mxu0 %v5632_v55  ;;  %4290 = vmatpush2.bf16.msra.mxu1 %v5635_v56  ;;  %v5682_v55 = vld [vmem:[#allocation7 + $0x424] ss:$16 sps:$4 sm:$0xff]  }
 0x7f7   :  { %4250 = vmatprep.subr.bf16.mxu0 %v5640_v57  ;;  %4291 = vmatprep.subr.bf16.mxu1 %v5643_v58  ;;  %v5685_v56 = vld [vmem:[#allocation7 + $0x624] ss:$16 sps:$4 sm:$0xff]   ;;  %v2144_v57 = vrot.slane %v6199_v3, %v2143_v53  ;;  %v2152_v58 = vrot.slane %v6199_v3, %v2151_v54 }
 0x7f8   :  { %v5730_v53 = vld [vmem:[#allocation7 + $0x524] ss:$16 sps:$4 sm:$0xff]  }
 0x7f9   :  { %v5733_v54 = vld [vmem:[#allocation7 + $0x724] ss:$16 sps:$4 sm:$0xff]  }
 0x7fa   :  { %4251 = vmatpush2.bf16.msra.mxu0 %v5638_v59  ;;  %4292 = vmatpush2.bf16.msra.mxu1 %v5641_v60  ;;  %v5680_v59 = vld [vmem:[#allocation7 + $0x420] ss:$16 sps:$4 sm:$0xff]  }
 0x7fb   :  { %4302 = vmatprep.subr.bf16.mxu0 %v5646_v61  ;;  %4343 = vmatprep.subr.bf16.mxu1 %v5649_v62  ;;  %v5683_v60 = vld [vmem:[#allocation7 + $0x620] ss:$16 sps:$4 sm:$0xff]  }
 0x85d   :  { %v2515_v9 = vpop.f32.mrf.mxu0  ;;  %v2556_v1 = vpop.f32.mrf.mxu1 }
 0x85e   :  { %v2516_v10 = vadd.f32 %v2515_v9, %v2124_v5  ;;  %v2557_v11 = vadd.f32 %v2556_v1, %v2132_v6  ;;  %v5686_v9 = vld [vmem:[#allocation7 + $0x400] ss:$16 sps:$4 sm:$0xff]  }
 0x85f   :  { %v2517_v12 = vpop.f32.mrf.mxu0  ;;  %v2558_v13 = vpop.f32.mrf.mxu1  ;;  %v5689_v1 = vld [vmem:[#allocation7 + $0x600] ss:$16 sps:$4 sm:$0xff]  }
 0x860   :  { %v2518_v14 = vadd.f32 %v2517_v12, %v2128_v7  ;;  %v2559_v15 = vadd.f32 %v2558_v13, %v2136_v8  ;;  %v2645_v16 = vmax.f32 %v2516_v10, 0.0  ;;  %v2647_v17 = vmax.f32 %v2557_v11, 0.0  ;;  %v5694_v12 = vld [vmem:[#allocation7 + $0x5e4] ss:$16 sps:$4 sm:$0xff]  }
 0x861   :  { %v2519_v18 = vpop.f32.mrf.mxu0  ;;  %v2560_v19 = vpop.f32.mrf.mxu1  ;;  %v5697_v13 = vld [vmem:[#allocation7 + $0x7e4] ss:$16 sps:$4 sm:$0xff]  }
 0x862   :  { %v2646_v20 = vmax.f32 %v2518_v14, 0.0  ;;  %v2648_v21 = vmax.f32 %v2559_v15, 0.0  ;;  %v6216_v31 = vpack.c.bf16 %v2645_v16, %v2645_v16  ;;  %v6218_v32 = vpack.c.bf16 %v2647_v17, %v2647_v17 }
 0x863   :  { %v2520_v22 = vpop.f32.mrf.mxu0  ;;  %v2561_v23 = vpop.f32.mrf.mxu1 }
 0x864   :  { %v6212_v24 = vpack.c.bf16 %v2646_v20, %v2646_v20  ;;  %v6214_v28 = vpack.c.bf16 %v2648_v21, %v2648_v21  ;;  %v5692_v20 = vld [vmem:[#allocation7 + $0x5e0] ss:$16 sps:$4 sm:$0xff]   ;;  %v5700_v22 = vld [vmem:[#allocation7 + $0x5c4] ss:$16 sps:$4 sm:$0xff]  }
 0x865   :  { %v5695_v21 = vld [vmem:[#allocation7 + $0x7e0] ss:$16 sps:$4 sm:$0xff]   ;;  %v5703_v23 = vld [vmem:[#allocation7 + $0x7c4] ss:$16 sps:$4 sm:$0xff]  }
 0x866   :  { %4252 = vmatprep.mubr.bf16.mxu0 %v6212_v24  ;;  %4293 = vmatprep.mubr.bf16.mxu1 %v6214_v28 }
 0x867   :  { %4253 = vmatmul.mubr.bf16.vlgmr.msra.gmra.mxu0 %v6216_v31  ;;  %4294 = vmatmul.mubr.bf16.vlgmr.msra.gmra.mxu1 %v6218_v32 }
 0x868   :  { %4303 = vmatpush1.bf16.msra.mxu0 %v5644_v30  ;;  %4344 = vmatpush1.bf16.msra.mxu1 %v5647_v27  ;;  %v5698_v30 = vld [vmem:[#allocation7 + $0x5c0] ss:$16 sps:$4 sm:$0xff]  }
 0x869   :  { %4304 = vmatprep.subr.bf16.mxu0 %v5652_v33  ;;  %4345 = vmatprep.subr.bf16.mxu1 %v5655_v35  ;;  %v5701_v27 = vld [vmem:[#allocation7 + $0x7c0] ss:$16 sps:$4 sm:$0xff]   ;;  %v5706_v33 = vld [vmem:[#allocation7 + $0x5a4] ss:$16 sps:$4 sm:$0xff]  }
 0x86a   :  { %v5709_v35 = vld [vmem:[#allocation7 + $0x7a4] ss:$16 sps:$4 sm:$0xff]  }
 0x86c   :  { %4305 = vmatpush1.bf16.msra.mxu0 %v5650_v36  ;;  %4346 = vmatpush1.bf16.msra.mxu1 %v5653_v37  ;;  %v5704_v36 = vld [vmem:[#allocation7 + $0x5a0] ss:$16 sps:$4 sm:$0xff]  }
 0x86d   :  { %4306 = vmatprep.subr.bf16.mxu0 %v5658_v38  ;;  %4347 = vmatprep.subr.bf16.mxu1 %v5661_v39  ;;  %v5707_v37 = vld [vmem:[#allocation7 + $0x7a0] ss:$16 sps:$4 sm:$0xff]   ;;  %v5712_v38 = vld [vmem:[#allocation7 + $0x584] ss:$16 sps:$4 sm:$0xff]  }
 0x86e   :  { %v5715_v39 = vld [vmem:[#allocation7 + $0x784] ss:$16 sps:$4 sm:$0xff]  }
 0x870   :  { %4307 = vmatpush1.bf16.msra.mxu0 %v5656_v40  ;;  %4348 = vmatpush1.bf16.msra.mxu1 %v5659_v41  ;;  %v5710_v40 = vld [vmem:[#allocation7 + $0x580] ss:$16 sps:$4 sm:$0xff]  }
 0x871   :  { %4308 = vmatprep.subr.bf16.mxu0 %v5664_v42  ;;  %4349 = vmatprep.subr.bf16.mxu1 %v5667_v43  ;;  %v5713_v41 = vld [vmem:[#allocation7 + $0x780] ss:$16 sps:$4 sm:$0xff]   ;;  %v5718_v42 = vld [vmem:[#allocation7 + $0x564] ss:$16 sps:$4 sm:$0xff]  }
 0x872   :  { %v5721_v43 = vld [vmem:[#allocation7 + $0x764] ss:$16 sps:$4 sm:$0xff]  }
 0x874   :  { %4309 = vmatpush1.bf16.msra.mxu0 %v5662_v44  ;;  %4350 = vmatpush1.bf16.msra.mxu1 %v5665_v45  ;;  %v5716_v44 = vld [vmem:[#allocation7 + $0x560] ss:$16 sps:$4 sm:$0xff]  }
 0x875   :  { %4310 = vmatprep.subr.bf16.mxu0 %v5670_v46  ;;  %4351 = vmatprep.subr.bf16.mxu1 %v5673_v47  ;;  %v5719_v45 = vld [vmem:[#allocation7 + $0x760] ss:$16 sps:$4 sm:$0xff]   ;;  %v2139_v46 = vsub.s32 4, %v6155_v25  ;;  %v2147_v47 = vsub.s32 6, %v6155_v25 }
 0x876   :  { %v5731_v25 = vld [vmem:[#allocation7 + $0x720] ss:$16 sps:$4 sm:$0xff]  }
 0x878   :  { %4311 = vmatpush1.bf16.msra.mxu0 %v5668_v48  ;;  %4352 = vmatpush1.bf16.msra.mxu1 %v5671_v49  ;;  %v5724_v48 = vld [vmem:[#allocation7 + $0x544] ss:$16 sps:$4 sm:$0xff]  }
 0x879   :  { %4312 = vmatprep.subr.bf16.mxu0 %v5676_v50  ;;  %4353 = vmatprep.subr.bf16.mxu1 %v5679_v51  ;;  %v5727_v49 = vld [vmem:[#allocation7 + $0x744] ss:$16 sps:$4 sm:$0xff]   ;;  %v5722_v50 = vld [vmem:[#allocation7 + $0x540] ss:$16 sps:$4 sm:$0xff]  }
 0x87a   :  { %v5725_v51 = vld [vmem:[#allocation7 + $0x740] ss:$16 sps:$4 sm:$0xff]  }
 0x87c   :  { %4313 = vmatpush1.bf16.msra.mxu0 %v5674_v52  ;;  %4354 = vmatpush1.bf16.msra.mxu1 %v5677_v0  ;;  %v2140_v52 = vrot.slane %v6199_v3, %v2139_v46  ;;  %v2148_v0 = vrot.slane %v6199_v3, %v2147_v47  ;;  %v5737_v3 = vld [vmem:[#allocation7 + $0x700] ss:$16 sps:$4 sm:$0xff]   ;;  %v5788_v46 = vld [vmem:[#allocation7 + $0x1e8] ss:$16 sps:$4 sm:$0xff]  }
 0x87d   :  { %v6228_v61 = vpop.f32.mrf.mxu0  ;;  %v6230_v62 = vpop.f32.mrf.mxu1  ;;  %4314 = vmatprep.subr.bf16.mxu0 %v5682_v55  ;;  %4355 = vmatprep.subr.bf16.mxu1 %v5685_v56  ;;  %v5728_v55 = vld [vmem:[#allocation7 + $0x520] ss:$16 sps:$4 sm:$0xff]   ;;  %v5791_v47 = vld [vmem:[#allocation7 + $0x3e8] ss:$16 sps:$4 sm:$0xff]  }
 0x87e   :  { %v2598_v56 = vadd.f32 %v6228_v61, %v2140_v52  ;;  %v5802_v52 = vld [vmem:[#allocation7 + $0x1ac] ss:$16 sps:$4 sm:$0xff]  }
 0x87f   :  { %v2599_v5 = vpop.f32.mrf.mxu0  ;;  %v2640_v6 = vpop.f32.mrf.mxu1 }
 0x880   :  { %v2600_v7 = vadd.f32 %v2599_v5, %v2144_v57  ;;  %v2641_v8 = vadd.f32 %v2640_v6, %v2152_v58  ;;  %4315 = vmatpush1.bf16.msra.mxu0 %v5680_v59  ;;  %4356 = vmatpush1.bf16.msra.mxu1 %v5683_v60  ;;  %v2639_v57 = vadd.f32 %v6230_v62, %v2148_v0  ;;  %v5736_v58 = vld [vmem:[#allocation7 + $0x504] ss:$16 sps:$4 sm:$0xff]   ;;  %v5734_v60 = vld [vmem:[#allocation7 + $0x500] ss:$16 sps:$4 sm:$0xff]   ;;  %v5742_v5 = vld [vmem:[#allocation7 + $0xec] ss:$16 sps:$4 sm:$0xff]  }
 0x881   :  { %v2601_v10 = vpop.f32.mrf.mxu0  ;;  %v2642_v11 = vpop.f32.mrf.mxu1  ;;  %4316 = vmatprep.subr.bf16.mxu0 %v5688_v63  ;;  %4357 = vmatprep.subr.bf16.mxu1 %v5691_v2  ;;  %v5739_v59 = vld [vmem:[#allocation7 + $0x704] ss:$16 sps:$4 sm:$0xff]   ;;  %v2649_v63 = vmax.f32 %v2598_v56, 0.0  ;;  %v5745_v6 = vld [vmem:[#allocation7 + $0x2ec] ss:$16 sps:$4 sm:$0xff]  }
 0x882   :  { %v2650_v14 = vmax.f32 %v2600_v7, 0.0  ;;  %v2652_v15 = vmax.f32 %v2641_v8, 0.0  ;;  %v2651_v2 = vmax.f32 %v2639_v57, 0.0  ;;  %v5740_v7 = vld [vmem:[#allocation7 + $0xe8] ss:$16 sps:$4 sm:$0xff]  }
 0x883   :  { %v2602_v16 = vpop.f32.mrf.mxu0  ;;  %v2643_v17 = vpop.f32.mrf.mxu1  ;;  %v6244_v61 = vpack.c.bf16 %v2649_v63, %v2649_v63  ;;  %v5743_v8 = vld [vmem:[#allocation7 + $0x2e8] ss:$16 sps:$4 sm:$0xff]   ;;  %v5805_v0 = vld [vmem:[#allocation7 + $0x3ac] ss:$16 sps:$4 sm:$0xff]  }
 0x884   :  { %v6232_v18 = vpack.c.bf16 %v2650_v14, %v2650_v14  ;;  %v6234_v19 = vpack.c.bf16 %v2652_v15, %v2652_v15  ;;  %4317 = vmatpush1.bf16.msra.mxu0 %v5686_v9  ;;  %4358 = vmatpush1.bf16.msra.mxu1 %v5689_v1  ;;  %v6246_v62 = vpack.c.bf16 %v2651_v2, %v2651_v2  ;;  %v5748_v9 = vld [vmem:[#allocation7 + $0xcc] ss:$16 sps:$4 sm:$0xff]   ;;  %v5746_v10 = vld [vmem:[#allocation7 + $0xc8] ss:$16 sps:$4 sm:$0xff]  }
 0x885   :  { %4318 = vmatprep.subr.bf16.mxu0 %v5694_v12  ;;  %4359 = vmatprep.subr.bf16.mxu1 %v5697_v13  ;;  %v5751_v1 = vld [vmem:[#allocation7 + $0x2cc] ss:$16 sps:$4 sm:$0xff]   ;;  %v5749_v11 = vld [vmem:[#allocation7 + $0x2c8] ss:$16 sps:$4 sm:$0xff]  }
 0x886   :  { %4334 = vmatprep.mubr.bf16.mxu0 %v6232_v18  ;;  %4375 = vmatprep.mubr.bf16.mxu1 %v6234_v19  ;;  %v5754_v12 = vld [vmem:[#allocation7 + $0xac] ss:$16 sps:$4 sm:$0xff]   ;;  %v5752_v14 = vld [vmem:[#allocation7 + $0xa8] ss:$16 sps:$4 sm:$0xff]  }
 0x887   :  { %v5757_v13 = vld [vmem:[#allocation7 + $0x2ac] ss:$16 sps:$4 sm:$0xff]   ;;  %v5755_v15 = vld [vmem:[#allocation7 + $0x2a8] ss:$16 sps:$4 sm:$0xff]  }
 0x888   :  { %4319 = vmatpush2.bf16.msra.mxu0 %v5692_v20  ;;  %4360 = vmatpush2.bf16.msra.mxu1 %v5695_v21  ;;  %v5760_v16 = vld [vmem:[#allocation7 + $0x8c] ss:$16 sps:$4 sm:$0xff]   ;;  %v5758_v20 = vld [vmem:[#allocation7 + $0x88] ss:$16 sps:$4 sm:$0xff]  }
 0x889   :  { %4320 = vmatprep.subr.bf16.mxu0 %v5700_v22  ;;  %4361 = vmatprep.subr.bf16.mxu1 %v5703_v23  ;;  %v5763_v17 = vld [vmem:[#allocation7 + $0x28c] ss:$16 sps:$4 sm:$0xff]   ;;  %v5764_v22 = vld [vmem:[#allocation7 + $0x68] ss:$16 sps:$4 sm:$0xff]  }
 0x88a   :  { %v5766_v21 = vld [vmem:[#allocation7 + $0x6c] ss:$16 sps:$4 sm:$0xff]   ;;  %v5767_v23 = vld [vmem:[#allocation7 + $0x268] ss:$16 sps:$4 sm:$0xff]  }
 0x88b   :  { %v5806_v56 = vld [vmem:[#allocation7 + $0x188] ss:$16 sps:$4 sm:$0xff]   ;;  %v5820_v63 = vld [vmem:[#allocation7 + $0x14c] ss:$16 sps:$4 sm:$0xff]  }
 0x88c   :  { %4321 = vmatpush2.bf16.msra.mxu0 %v5698_v30  ;;  %4362 = vmatpush2.bf16.msra.mxu1 %v5701_v27  ;;  %v5772_v30 = vld [vmem:[#allocation7 + $0x4c] ss:$16 sps:$4 sm:$0xff]   ;;  %v5809_v57 = vld [vmem:[#allocation7 + $0x388] ss:$16 sps:$4 sm:$0xff]  }
 0x88d   :  { %4322 = vmatprep.subr.bf16.mxu0 %v5706_v33  ;;  %4363 = vmatprep.subr.bf16.mxu1 %v5709_v35  ;;  %v5775_v27 = vld [vmem:[#allocation7 + $0x24c] ss:$16 sps:$4 sm:$0xff]   ;;  %v5770_v33 = vld [vmem:[#allocation7 + $0x48] ss:$16 sps:$4 sm:$0xff]  }
 0x88e   :  { %v5773_v35 = vld [vmem:[#allocation7 + $0x248] ss:$16 sps:$4 sm:$0xff]   ;;  %v5823_v2 = vld [vmem:[#allocation7 + $0x34c] ss:$16 sps:$4 sm:$0xff]  }
 0x890   :  { %4323 = vmatpush2.bf16.msra.mxu0 %v5704_v36  ;;  %4364 = vmatpush2.bf16.msra.mxu1 %v5707_v37  ;;  %v5778_v36 = vld [vmem:[#allocation7 + $0x2c] ss:$16 sps:$4 sm:$0xff]  }
 0x891   :  { %4324 = vmatprep.subr.bf16.mxu0 %v5712_v38  ;;  %4365 = vmatprep.subr.bf16.mxu1 %v5715_v39  ;;  %v5781_v37 = vld [vmem:[#allocation7 + $0x22c] ss:$16 sps:$4 sm:$0xff]   ;;  %v5776_v38 = vld [vmem:[#allocation7 + $0x28] ss:$16 sps:$4 sm:$0xff]  }
 0x892   :  { %v5779_v39 = vld [vmem:[#allocation7 + $0x228] ss:$16 sps:$4 sm:$0xff]  }
 0x894   :  { %4325 = vmatpush2.bf16.msra.mxu0 %v5710_v40  ;;  %4366 = vmatpush2.bf16.msra.mxu1 %v5713_v41  ;;  %v5784_v40 = vld [vmem:[#allocation7 + $0xc] ss:$16 sps:$4 sm:$0xff]  }
 0x895   :  { %4326 = vmatprep.subr.bf16.mxu0 %v5718_v42  ;;  %4367 = vmatprep.subr.bf16.mxu1 %v5721_v43  ;;  %v5787_v41 = vld [vmem:[#allocation7 + $0x20c] ss:$16 sps:$4 sm:$0xff]   ;;  %v5782_v42 = vld [vmem:[#allocation7 + $0x8] ss:$16 sps:$4 sm:$0xff]  }
 0x896   :  { %v5785_v43 = vld [vmem:[#allocation7 + $0x208] ss:$16 sps:$4 sm:$0xff]  }
 0x898   :  { %4327 = vmatpush2.bf16.msra.mxu0 %v5716_v44  ;;  %4368 = vmatpush2.bf16.msra.mxu1 %v5719_v45  ;;  %v5790_v44 = vld [vmem:[#allocation7 + $0x1ec] ss:$16 sps:$4 sm:$0xff]  }
 0x899   :  { %4328 = vmatprep.subr.bf16.mxu0 %v5724_v48  ;;  %4369 = vmatprep.subr.bf16.mxu1 %v5727_v49  ;;  %v5793_v45 = vld [vmem:[#allocation7 + $0x3ec] ss:$16 sps:$4 sm:$0xff]  }
 0x89a   :  { %v5796_v48 = vld [vmem:[#allocation7 + $0x1cc] ss:$16 sps:$4 sm:$0xff]  }
 0x89b   :  { %v5799_v49 = vld [vmem:[#allocation7 + $0x3cc] ss:$16 sps:$4 sm:$0xff]  }
 0x89c   :  { %4329 = vmatpush2.bf16.msra.mxu0 %v5722_v50  ;;  %4370 = vmatpush2.bf16.msra.mxu1 %v5725_v51  ;;  %v5794_v50 = vld [vmem:[#allocation7 + $0x1c8] ss:$16 sps:$4 sm:$0xff]  }
 0x89d   :  { %4330 = vmatprep.subr.bf16.mxu0 %v5730_v53  ;;  %4371 = vmatprep.subr.bf16.mxu1 %v5733_v54  ;;  %v5797_v51 = vld [vmem:[#allocation7 + $0x3c8] ss:$16 sps:$4 sm:$0xff]  }
 0x89e   :  { %v5800_v53 = vld [vmem:[#allocation7 + $0x1a8] ss:$16 sps:$4 sm:$0xff]  }
 0x89f   :  { %v5803_v54 = vld [vmem:[#allocation7 + $0x3a8] ss:$16 sps:$4 sm:$0xff]  }
 0x8a0   :  { %4331 = vmatpush2.bf16.msra.mxu0 %v5728_v55  ;;  %4372 = vmatpush2.bf16.msra.mxu1 %v5731_v25  ;;  %v5808_v55 = vld [vmem:[#allocation7 + $0x18c] ss:$16 sps:$4 sm:$0xff]  }
 0x8a1   :  { %4332 = vmatprep.subr.bf16.mxu0 %v5736_v58  ;;  %4373 = vmatprep.subr.bf16.mxu1 %v5739_v59  ;;  %v5811_v25 = vld [vmem:[#allocation7 + $0x38c] ss:$16 sps:$4 sm:$0xff]  }
 0x8a2   :  { %v5814_v58 = vld [vmem:[#allocation7 + $0x16c] ss:$16 sps:$4 sm:$0xff]  }
 0x8a3   :  { %v5817_v59 = vld [vmem:[#allocation7 + $0x36c] ss:$16 sps:$4 sm:$0xff]  }
 0x8a4   :  { %4333 = vmatpush2.bf16.msra.mxu0 %v5734_v60  ;;  %4374 = vmatpush2.bf16.msra.mxu1 %v5737_v3  ;;  %v5812_v60 = vld [vmem:[#allocation7 + $0x168] ss:$16 sps:$4 sm:$0xff]  }
 0x8a5   :  { %4384 = vmatprep.subr.bf16.mxu0 %v5742_v5  ;;  %4425 = vmatprep.subr.bf16.mxu1 %v5745_v6  ;;  %v5815_v3 = vld [vmem:[#allocation7 + $0x368] ss:$16 sps:$4 sm:$0xff]  }
 0x8a6   :  { %v5818_v5 = vld [vmem:[#allocation7 + $0x148] ss:$16 sps:$4 sm:$0xff]  }
 0x8a7   :  { %4335 = vmatmul.mubr.bf16.vlgmr.msra.gmra.mxu0 %v6244_v61  ;;  %4376 = vmatmul.mubr.bf16.vlgmr.msra.gmra.mxu1 %v6246_v62  ;;  %v5821_v6 = vld [vmem:[#allocation7 + $0x348] ss:$16 sps:$4 sm:$0xff]  }
 0x8a8   :  { %4385 = vmatpush1.bf16.msra.mxu0 %v5740_v7  ;;  %4416 = vmatprep.mubr.bf16.mxu0 %v6212_v24  ;;  %v5761_v24 = vld [vmem:[#allocation7 + $0x288] ss:$16 sps:$4 sm:$0xff]   ;;  %v5826_v7 = vld [vmem:[#allocation7 + $0x12c] ss:$16 sps:$4 sm:$0xff]  }
 0x8a9   :  { %4426 = vmatpush1.bf16.msra.mxu1 %v5743_v8  ;;  %4457 = vmatprep.mubr.bf16.mxu1 %v6214_v28  ;;  %v5769_v28 = vld [vmem:[#allocation7 + $0x26c] ss:$16 sps:$4 sm:$0xff]  }
 0x8aa   :  { %4386 = vmatprep.subr.bf16.mxu0 %v5748_v9  ;;  %4427 = vmatprep.subr.bf16.mxu1 %v5751_v1  ;;  %v5829_v8 = vld [vmem:[#allocation7 + $0x32c] ss:$16 sps:$4 sm:$0xff]   ;;  %v5824_v9 = vld [vmem:[#allocation7 + $0x128] ss:$16 sps:$4 sm:$0xff]  }
 0x8ab   :  { %v5827_v1 = vld [vmem:[#allocation7 + $0x328] ss:$16 sps:$4 sm:$0xff]  }
 0x8ac   :  { %4387 = vmatpush1.bf16.msra.mxu0 %v5746_v10  ;;  %v5832_v10 = vld [vmem:[#allocation7 + $0x10c] ss:$16 sps:$4 sm:$0xff]  }
 0x8ad   :  { %4428 = vmatpush1.bf16.msra.mxu1 %v5749_v11  ;;  %4388 = vmatprep.subr.bf16.mxu0 %v5754_v12  ;;  %v5835_v11 = vld [vmem:[#allocation7 + $0x30c] ss:$16 sps:$4 sm:$0xff]   ;;  %v5830_v12 = vld [vmem:[#allocation7 + $0x108] ss:$16 sps:$4 sm:$0xff]  }
 0x8ae   :  { %4429 = vmatprep.subr.bf16.mxu1 %v5757_v13  ;;  %v5833_v13 = vld [vmem:[#allocation7 + $0x308] ss:$16 sps:$4 sm:$0xff]  }
 0x8b0   :  { %4389 = vmatpush1.bf16.msra.mxu0 %v5752_v14  ;;  %v5838_v14 = vld [vmem:[#allocation7 + $0x4ec] ss:$16 sps:$4 sm:$0xff]  }
 0x8b1   :  { %4430 = vmatpush1.bf16.msra.mxu1 %v5755_v15  ;;  %4390 = vmatprep.subr.bf16.mxu0 %v5760_v16  ;;  %v5841_v15 = vld [vmem:[#allocation7 + $0x6ec] ss:$16 sps:$4 sm:$0xff]   ;;  %v5836_v16 = vld [vmem:[#allocation7 + $0x4e8] ss:$16 sps:$4 sm:$0xff]  }
 0x8b2   :  { %4431 = vmatprep.subr.bf16.mxu1 %v5763_v17  ;;  %v5839_v17 = vld [vmem:[#allocation7 + $0x6e8] ss:$16 sps:$4 sm:$0xff]  }
 0x8b4   :  { %4391 = vmatpush1.bf16.msra.mxu0 %v5758_v20  ;;  %v5844_v20 = vld [vmem:[#allocation7 + $0x4cc] ss:$16 sps:$4 sm:$0xff]  }
 0x8b5   :  { %4432 = vmatpush1.bf16.msra.mxu1 %v5761_v24  ;;  %4392 = vmatprep.subr.bf16.mxu0 %v5766_v21  ;;  %v5847_v24 = vld [vmem:[#allocation7 + $0x6cc] ss:$16 sps:$4 sm:$0xff]   ;;  %v5842_v21 = vld [vmem:[#allocation7 + $0x4c8] ss:$16 sps:$4 sm:$0xff]  }
 0x8b6   :  { %4433 = vmatprep.subr.bf16.mxu1 %v5769_v28  ;;  %v5845_v28 = vld [vmem:[#allocation7 + $0x6c8] ss:$16 sps:$4 sm:$0xff]  }
 0x8b8   :  { %4393 = vmatpush1.bf16.msra.mxu0 %v5764_v22  ;;  %v5850_v22 = vld [vmem:[#allocation7 + $0x4ac] ss:$16 sps:$4 sm:$0xff]  }
 0x8b9   :  { %4434 = vmatpush1.bf16.msra.mxu1 %v5767_v23  ;;  %4394 = vmatprep.subr.bf16.mxu0 %v5772_v30  ;;  %v5853_v23 = vld [vmem:[#allocation7 + $0x6ac] ss:$16 sps:$4 sm:$0xff]   ;;  %v5848_v30 = vld [vmem:[#allocation7 + $0x4a8] ss:$16 sps:$4 sm:$0xff]  }
 0x8ba   :  { %4435 = vmatprep.subr.bf16.mxu1 %v5775_v27  ;;  %v5856_v27 = vld [vmem:[#allocation7 + $0x48c] ss:$16 sps:$4 sm:$0xff]  }
 0x8bc   :  { %4395 = vmatpush1.bf16.msra.mxu0 %v5770_v33  ;;  %v5854_v33 = vld [vmem:[#allocation7 + $0x488] ss:$16 sps:$4 sm:$0xff]  }
 0x8bd   :  { %4436 = vmatpush1.bf16.msra.mxu1 %v5773_v35  ;;  %4396 = vmatprep.subr.bf16.mxu0 %v5778_v36  ;;  %v5862_v35 = vld [vmem:[#allocation7 + $0x46c] ss:$16 sps:$4 sm:$0xff]  }
 0x8be   :  { %4437 = vmatprep.subr.bf16.mxu1 %v5781_v37  ;;  %v5865_v36 = vld [vmem:[#allocation7 + $0x66c] ss:$16 sps:$4 sm:$0xff]   ;;  %v5863_v37 = vld [vmem:[#allocation7 + $0x668] ss:$16 sps:$4 sm:$0xff]  }
 0x8c0   :  { %4397 = vmatpush1.bf16.msra.mxu0 %v5776_v38  ;;  %v5868_v38 = vld [vmem:[#allocation7 + $0x44c] ss:$16 sps:$4 sm:$0xff]  }
 0x8c1   :  { %4438 = vmatpush1.bf16.msra.mxu1 %v5779_v39  ;;  %4398 = vmatprep.subr.bf16.mxu0 %v5784_v40  ;;  %v5871_v39 = vld [vmem:[#allocation7 + $0x64c] ss:$16 sps:$4 sm:$0xff]   ;;  %v5866_v40 = vld [vmem:[#allocation7 + $0x448] ss:$16 sps:$4 sm:$0xff]  }
 0x8c2   :  { %4439 = vmatprep.subr.bf16.mxu1 %v5787_v41  ;;  %v5869_v41 = vld [vmem:[#allocation7 + $0x648] ss:$16 sps:$4 sm:$0xff]  }
 0x8c4   :  { %4399 = vmatpush1.bf16.msra.mxu0 %v5782_v42  ;;  %v5874_v42 = vld [vmem:[#allocation7 + $0x42c] ss:$16 sps:$4 sm:$0xff]  }
 0x8c5   :  { %4440 = vmatpush1.bf16.msra.mxu1 %v5785_v43  ;;  %4400 = vmatprep.subr.bf16.mxu0 %v5790_v44  ;;  %v5877_v43 = vld [vmem:[#allocation7 + $0x62c] ss:$16 sps:$4 sm:$0xff]   ;;  %v5872_v44 = vld [vmem:[#allocation7 + $0x428] ss:$16 sps:$4 sm:$0xff]  }
 0x8c6   :  { %4441 = vmatprep.subr.bf16.mxu1 %v5793_v45  ;;  %v5875_v45 = vld [vmem:[#allocation7 + $0x628] ss:$16 sps:$4 sm:$0xff]  }
 0x8c8   :  { %4401 = vmatpush2.bf16.msra.mxu0 %v5788_v46  ;;  %v5880_v46 = vld [vmem:[#allocation7 + $0x40c] ss:$16 sps:$4 sm:$0xff]  }
 0x8c9   :  { %4442 = vmatpush2.bf16.msra.mxu1 %v5791_v47  ;;  %4402 = vmatprep.subr.bf16.mxu0 %v5796_v48  ;;  %v5883_v47 = vld [vmem:[#allocation7 + $0x60c] ss:$16 sps:$4 sm:$0xff]   ;;  %v5878_v48 = vld [vmem:[#allocation7 + $0x408] ss:$16 sps:$4 sm:$0xff]  }
 0x8ca   :  { %4443 = vmatprep.subr.bf16.mxu1 %v5799_v49  ;;  %v5881_v49 = vld [vmem:[#allocation7 + $0x608] ss:$16 sps:$4 sm:$0xff]  }
 0x8cc   :  { %4403 = vmatpush2.bf16.msra.mxu0 %v5794_v50  ;;  %v5886_v50 = vld [vmem:[#allocation7 + $0x5ec] ss:$16 sps:$4 sm:$0xff]  }
 0x8cd   :  { %4444 = vmatpush2.bf16.msra.mxu1 %v5797_v51  ;;  %4404 = vmatprep.subr.bf16.mxu0 %v5802_v52  ;;  %v5889_v51 = vld [vmem:[#allocation7 + $0x7ec] ss:$16 sps:$4 sm:$0xff]   ;;  %v5884_v52 = vld [vmem:[#allocation7 + $0x5e8] ss:$16 sps:$4 sm:$0xff]  }
 0x8ce   :  { %4445 = vmatprep.subr.bf16.mxu1 %v5805_v0  ;;  %v5887_v0 = vld [vmem:[#allocation7 + $0x7e8] ss:$16 sps:$4 sm:$0xff]  }
 0x8d0   :  { %4405 = vmatpush2.bf16.msra.mxu0 %v5800_v53  ;;  %v5892_v53 = vld [vmem:[#allocation7 + $0x5cc] ss:$16 sps:$4 sm:$0xff]  }
 0x8d1   :  { %4446 = vmatpush2.bf16.msra.mxu1 %v5803_v54  ;;  %4406 = vmatprep.subr.bf16.mxu0 %v5808_v55  ;;  %v5895_v54 = vld [vmem:[#allocation7 + $0x7cc] ss:$16 sps:$4 sm:$0xff]   ;;  %v5890_v55 = vld [vmem:[#allocation7 + $0x5c8] ss:$16 sps:$4 sm:$0xff]  }
 0x8d2   :  { %4447 = vmatprep.subr.bf16.mxu1 %v5811_v25  ;;  %v5893_v25 = vld [vmem:[#allocation7 + $0x7c8] ss:$16 sps:$4 sm:$0xff]  }
 0x8d4   :  { %4407 = vmatpush2.bf16.msra.mxu0 %v5806_v56  ;;  %v5898_v56 = vld [vmem:[#allocation7 + $0x5ac] ss:$16 sps:$4 sm:$0xff]  }
 0x8d5   :  { %4448 = vmatpush2.bf16.msra.mxu1 %v5809_v57  ;;  %4408 = vmatprep.subr.bf16.mxu0 %v5814_v58  ;;  %v5901_v57 = vld [vmem:[#allocation7 + $0x7ac] ss:$16 sps:$4 sm:$0xff]   ;;  %v5896_v58 = vld [vmem:[#allocation7 + $0x5a8] ss:$16 sps:$4 sm:$0xff]  }
 0x8d6   :  { %4449 = vmatprep.subr.bf16.mxu1 %v5817_v59  ;;  %v5899_v59 = vld [vmem:[#allocation7 + $0x7a8] ss:$16 sps:$4 sm:$0xff]  }
 0x8d8   :  { %4409 = vmatpush2.bf16.msra.mxu0 %v5812_v60  ;;  %v5904_v60 = vld [vmem:[#allocation7 + $0x58c] ss:$16 sps:$4 sm:$0xff]  }
 0x8d9   :  { %4450 = vmatpush2.bf16.msra.mxu1 %v5815_v3  ;;  %4410 = vmatprep.subr.bf16.mxu0 %v5820_v63  ;;  %v5907_v3 = vld [vmem:[#allocation7 + $0x78c] ss:$16 sps:$4 sm:$0xff]   ;;  %v5902_v63 = vld [vmem:[#allocation7 + $0x588] ss:$16 sps:$4 sm:$0xff]  }
 0x8da   :  { %4451 = vmatprep.subr.bf16.mxu1 %v5823_v2  ;;  %v5905_v2 = vld [vmem:[#allocation7 + $0x788] ss:$16 sps:$4 sm:$0xff]  }
 0x8dc   :  { %4411 = vmatpush2.bf16.msra.mxu0 %v5818_v5  ;;  %v5910_v5 = vld [vmem:[#allocation7 + $0x56c] ss:$16 sps:$4 sm:$0xff]  }
 0x8dd   :  { %4452 = vmatpush2.bf16.msra.mxu1 %v5821_v6  ;;  %4412 = vmatprep.subr.bf16.mxu0 %v5826_v7  ;;  %v5913_v6 = vld [vmem:[#allocation7 + $0x76c] ss:$16 sps:$4 sm:$0xff]   ;;  %v5908_v7 = vld [vmem:[#allocation7 + $0x568] ss:$16 sps:$4 sm:$0xff]  }
 0x8de   :  { %4453 = vmatprep.subr.bf16.mxu1 %v5829_v8  ;;  %v5911_v8 = vld [vmem:[#allocation7 + $0x768] ss:$16 sps:$4 sm:$0xff]  }
 0x8e0   :  { %4413 = vmatpush2.bf16.msra.mxu0 %v5824_v9  ;;  %v5916_v9 = vld [vmem:[#allocation7 + $0x54c] ss:$16 sps:$4 sm:$0xff]  }
 0x8e1   :  { %4454 = vmatpush2.bf16.msra.mxu1 %v5827_v1  ;;  %4414 = vmatprep.subr.bf16.mxu0 %v5832_v10  ;;  %v5919_v1 = vld [vmem:[#allocation7 + $0x74c] ss:$16 sps:$4 sm:$0xff]   ;;  %v5914_v10 = vld [vmem:[#allocation7 + $0x548] ss:$16 sps:$4 sm:$0xff]  }
 0x8e2   :  { %4455 = vmatprep.subr.bf16.mxu1 %v5835_v11  ;;  %v5917_v11 = vld [vmem:[#allocation7 + $0x748] ss:$16 sps:$4 sm:$0xff]  }
 0x8e4   :  { %4415 = vmatpush2.bf16.msra.mxu0 %v5830_v12  ;;  %v5922_v12 = vld [vmem:[#allocation7 + $0x52c] ss:$16 sps:$4 sm:$0xff]  }
 0x8e5   :  { %4456 = vmatpush2.bf16.msra.mxu1 %v5833_v13  ;;  %4466 = vmatprep.subr.bf16.mxu0 %v5838_v14  ;;  %v5925_v13 = vld [vmem:[#allocation7 + $0x72c] ss:$16 sps:$4 sm:$0xff]   ;;  %v5920_v14 = vld [vmem:[#allocation7 + $0x528] ss:$16 sps:$4 sm:$0xff]  }
 0x8e6   :  { %4507 = vmatprep.subr.bf16.mxu1 %v5841_v15  ;;  %v5923_v15 = vld [vmem:[#allocation7 + $0x728] ss:$16 sps:$4 sm:$0xff]  }
 0x8e7   :  { %4417 = vmatmul.mubr.bf16.vlgmr.msra.gmra.mxu0 %v6216_v31  ;;  %v5851_v31 = vld [vmem:[#allocation7 + $0x6a8] ss:$16 sps:$4 sm:$0xff]  }
 0x8e8   :  { %4458 = vmatmul.mubr.bf16.vlgmr.msra.gmra.mxu1 %v6218_v32  ;;  %4467 = vmatpush1.bf16.msra.mxu0 %v5836_v16  ;;  %v5859_v32 = vld [vmem:[#allocation7 + $0x68c] ss:$16 sps:$4 sm:$0xff]  }
 0x8e9   :  { %4498 = vmatprep.mubr.bf16.mxu0 %v6232_v18  ;;  %4508 = vmatpush1.bf16.msra.mxu1 %v5839_v17  ;;  %v5857_v18 = vld [vmem:[#allocation7 + $0x688] ss:$16 sps:$4 sm:$0xff]   ;;  %v5928_v16 = vld [vmem:[#allocation7 + $0x50c] ss:$16 sps:$4 sm:$0xff]  }
 0x8ea   :  { %4539 = vmatprep.mubr.bf16.mxu1 %v6234_v19  ;;  %4468 = vmatprep.subr.bf16.mxu0 %v5844_v20  ;;  %v5860_v19 = vld [vmem:[#allocation7 + $0x468] ss:$16 sps:$4 sm:$0xff]   ;;  %v5931_v17 = vld [vmem:[#allocation7 + $0x70c] ss:$16 sps:$4 sm:$0xff]  }
 0x8eb   :  { %4509 = vmatprep.subr.bf16.mxu1 %v5847_v24  ;;  %v5926_v20 = vld [vmem:[#allocation7 + $0x508] ss:$16 sps:$4 sm:$0xff]  }
 0x8ec   :  { %4469 = vmatpush1.bf16.msra.mxu0 %v5842_v21  ;;  %v5929_v24 = vld [vmem:[#allocation7 + $0x708] ss:$16 sps:$4 sm:$0xff]  }
 0x8ed   :  { %4510 = vmatpush1.bf16.msra.mxu1 %v5845_v28  ;;  %4470 = vmatprep.subr.bf16.mxu0 %v5850_v22  ;;  %v2910_v21 = vld [vmem:[#allocation10 + $0x42] ss:$8 sm:$0xf] }
 0x8ee   :  { %4511 = vmatprep.subr.bf16.mxu1 %v5853_v23  ;;  %v2923_v28 = vrot.slane %v2910_v21, %v6158_v26  ;;  %v2927_v22 = vrot.slane %v2910_v21, %v6161_v29 }
 0x8f0   :  { %4471 = vmatpush1.bf16.msra.mxu0 %v5848_v30 }
 0x8f1   :  { %4512 = vmatpush1.bf16.msra.mxu1 %v5851_v31  ;;  %4472 = vmatprep.subr.bf16.mxu0 %v5856_v27 }
 0x8f2   :  { %4513 = vmatprep.subr.bf16.mxu1 %v5859_v32 }
 0x8f4   :  { %4473 = vmatpush1.bf16.msra.mxu0 %v5854_v33 }
 0x8f5   :  { %4514 = vmatpush1.bf16.msra.mxu1 %v5857_v18  ;;  %4474 = vmatprep.subr.bf16.mxu0 %v5862_v35 }
 0x8f6   :  { %4515 = vmatprep.subr.bf16.mxu1 %v5865_v36 }
 0x8f8   :  { %4475 = vmatpush1.bf16.msra.mxu0 %v5860_v19 }
 0x8f9   :  { %4516 = vmatpush1.bf16.msra.mxu1 %v5863_v37  ;;  %4476 = vmatprep.subr.bf16.mxu0 %v5868_v38 }
 0x8fa   :  { %4517 = vmatprep.subr.bf16.mxu1 %v5871_v39 }
 0x8fc   :  { %4477 = vmatpush1.bf16.msra.mxu0 %v5866_v40 }
 0x8fd   :  { %4518 = vmatpush1.bf16.msra.mxu1 %v5869_v41  ;;  %4478 = vmatprep.subr.bf16.mxu0 %v5874_v42  ;;  %v4553_v42 = vld [vmem:[#allocation10 + $0x44] ss:$8 sm:$0xf] }
 0x8fe   :  { %4519 = vmatprep.subr.bf16.mxu1 %v5877_v43 }
 0x900   :  { %4479 = vmatpush1.bf16.msra.mxu0 %v5872_v44 }
 0x901   :  { %4520 = vmatpush1.bf16.msra.mxu1 %v5875_v45  ;;  %4480 = vmatprep.subr.bf16.mxu0 %v5880_v46 }
 0x902   :  { %4521 = vmatprep.subr.bf16.mxu1 %v5883_v47 }
 0x904   :  { %4481 = vmatpush1.bf16.msra.mxu0 %v5878_v48  ;;  %v4559_v48 = vrot.slane %v4553_v42, %v6158_v26  ;;  %v2935_v26 = vrot.slane %v2910_v21, %v6202_v4 }
 0x905   :  { %4522 = vmatpush1.bf16.msra.mxu1 %v5881_v49  ;;  %4482 = vmatprep.subr.bf16.mxu0 %v5886_v50  ;;  %v4563_v50 = vrot.slane %v4553_v42, %v6161_v29 }
 0x906   :  { %4523 = vmatprep.subr.bf16.mxu1 %v5889_v51 }
 0x908   :  { %4483 = vmatpush2.bf16.msra.mxu0 %v5884_v52 }
 0x909   :  { %4524 = vmatpush2.bf16.msra.mxu1 %v5887_v0  ;;  %4484 = vmatprep.subr.bf16.mxu0 %v5892_v53 }
 0x90a   :  { %4525 = vmatprep.subr.bf16.mxu1 %v5895_v54 }
 0x90c   :  { %4485 = vmatpush2.bf16.msra.mxu0 %v5890_v55 }
 0x90d   :  { %4526 = vmatpush2.bf16.msra.mxu1 %v5893_v25  ;;  %4486 = vmatprep.subr.bf16.mxu0 %v5898_v56 }
 0x90e   :  { %4527 = vmatprep.subr.bf16.mxu1 %v5901_v57 }
 0x910   :  { %4487 = vmatpush2.bf16.msra.mxu0 %v5896_v58 }
 0x911   :  { %4528 = vmatpush2.bf16.msra.mxu1 %v5899_v59  ;;  %4488 = vmatprep.subr.bf16.mxu0 %v5904_v60 }
 0x912   :  { %4529 = vmatprep.subr.bf16.mxu1 %v5907_v3 }
 0x914   :  { %4489 = vmatpush2.bf16.msra.mxu0 %v5902_v63 }
 0x915   :  { %4530 = vmatpush2.bf16.msra.mxu1 %v5905_v2  ;;  %4490 = vmatprep.subr.bf16.mxu0 %v5910_v5  ;;  %v2931_v2 = vrot.slane %v2910_v21, %v6169_v34 }
 0x916   :  { %4531 = vmatprep.subr.bf16.mxu1 %v5913_v6 }
 0x918   :  { %4491 = vmatpush2.bf16.msra.mxu0 %v5908_v7 }
 0x919   :  { %4532 = vmatpush2.bf16.msra.mxu1 %v5911_v8  ;;  %4492 = vmatprep.subr.bf16.mxu0 %v5916_v9 }
 0x91a   :  { %4533 = vmatprep.subr.bf16.mxu1 %v5919_v1 }
 0x91c   :  { %4493 = vmatpush2.bf16.msra.mxu0 %v5914_v10 }
 0x91d   :  { %4534 = vmatpush2.bf16.msra.mxu1 %v5917_v11  ;;  %4494 = vmatprep.subr.bf16.mxu0 %v5922_v12  ;;  %v4567_v12 = vrot.slane %v4553_v42, %v6169_v34 }
 0x91e   :  { %4535 = vmatprep.subr.bf16.mxu1 %v5925_v13 }
 0x920   :  { %4495 = vmatpush2.bf16.msra.mxu0 %v5920_v14 }
 0x921   :  { %4536 = vmatpush2.bf16.msra.mxu1 %v5923_v15  ;;  %4496 = vmatprep.subr.bf16.mxu0 %v5928_v16 }
 0x922   :  { %4537 = vmatprep.subr.bf16.mxu1 %v5931_v17 }
 0x924   :  { %4497 = vmatpush2.bf16.msra.mxu0 %v5926_v20 }
 0x925   :  { %4538 = vmatpush2.bf16.msra.mxu1 %v5929_v24  ;;  %v4571_v24 = vrot.slane %v4553_v42, %v6202_v4 }
 0x927   :  { %4499 = vmatmul.mubr.bf16.vlgmr.msra.gmra.mxu0 %v6244_v61  ;;  %v4254_v23 = vpop.f32.mrf.mxu0  ;;  %v4295_v30 = vpop.f32.mrf.mxu1 }
 0x928   :  { %4540 = vmatmul.mubr.bf16.vlgmr.msra.gmra.mxu1 %v6246_v62  ;;  %v4255_v31 = vadd.f32 %v4254_v23, %v2923_v28 }
 0x929   :  { %v4256_v27 = vpop.f32.mrf.mxu0  ;;  %v4297_v32 = vpop.f32.mrf.mxu1 }
 0x92a   :  { %v4296_v33 = vadd.f32 %v4295_v30, %v4255_v31  ;;  %v4257_v18 = vadd.f32 %v4256_v27, %v2927_v22 }
 0x92b   :  { %v4258_v35 = vpop.f32.mrf.mxu0  ;;  %v4299_v36 = vpop.f32.mrf.mxu1 }
 0x92c   :  { %v4298_v19 = vadd.f32 %v4297_v32, %v4257_v18  ;;  %v4554_v32 = vld [vmem:[#allocation10 + $0x43] ss:$0 sm:$0xff] }
 0x92d   :  { %v4259_v37 = vpop.f32.mrf.mxu0  ;;  %v4300_v38 = vpop.f32.mrf.mxu1 }
 0x967   :  { %v4336_v39 = vpop.f32.mrf.mxu0  ;;  %v4377_v40 = vpop.f32.mrf.mxu1 }
 0x968   :  { %v4337_v41 = vadd.f32 %v4336_v39, %v4296_v33 }
 0x969   :  { %v4338_v43 = vpop.f32.mrf.mxu0  ;;  %v4379_v61 = vpop.f32.mrf.mxu1 }
 0x96a   :  { %v4378_v44 = vadd.f32 %v4377_v40, %v4337_v41  ;;  %v4339_v45 = vadd.f32 %v4338_v43, %v4298_v19 }
 0x96b   :  { %v4340_v46 = vpop.f32.mrf.mxu0  ;;  %v4381_v62 = vpop.f32.mrf.mxu1 }
 0x96c   :  { %v4548_v47 = vmax.f32 %v4378_v44, 0.0  ;;  %v4380_v49 = vadd.f32 %v4379_v61, %v4339_v45 }
 0x96d   :  { %v4341_v51 = vpop.f32.mrf.mxu0  ;;  %v4382_v52 = vpop.f32.mrf.mxu1 }
 0x96e   :  { %v4549_v0 = vmax.f32 %v4380_v49, 0.0  ;;  %v4576_v53 = vmul.f32 %v4559_v48, %v4548_v47 }
 0x970   :  { %v4577_v54 = vmul.f32 %v4563_v50, %v4549_v0 }
 0x972   :  { %v4580_v55 = vadd.f32 %v4577_v54, %v4576_v53 }
 0x9a7   :  { %v4418_v25 = vpop.f32.mrf.mxu0 }
 0x9a8   :  { %v4459_v56 = vpop.f32.mrf.mxu1  ;;  %v4419_v5 = vadd.f32 %v4418_v25, %v2931_v2 }
 0x9a9   :  { %v4420_v57 = vpop.f32.mrf.mxu0 }
 0x9aa   :  { %v4461_v58 = vpop.f32.mrf.mxu1  ;;  %v4421_v29 = vadd.f32 %v4420_v57, %v2935_v26  ;;  %v4460_v6 = vadd.f32 %v4459_v56, %v4419_v5 }
 0x9ab   :  { %v4422_v59 = vpop.f32.mrf.mxu0 }
 0x9ac   :  { %v4463_v60 = vpop.f32.mrf.mxu1  ;;  %v4462_v8 = vadd.f32 %v4461_v58, %v4421_v29 }
 0x9ad   :  { %v4423_v3 = vpop.f32.mrf.mxu0 }
 0x9ae   :  { %v4464_v63 = vpop.f32.mrf.mxu1 }
 0x9e7   :  { %v4500_v7 = vpop.f32.mrf.mxu0 }
 0x9e8   :  { %v4501_v9 = vadd.f32 %v4500_v7, %v4460_v6  ;;  %v4541_v1 = vpop.f32.mrf.mxu1 }
 0x9e9   :  { %v4502_v10 = vpop.f32.mrf.mxu0 }
 0x9ea   :  { %v4542_v11 = vadd.f32 %v4541_v1, %v4501_v9  ;;  %v4503_v13 = vadd.f32 %v4502_v10, %v4462_v8  ;;  %v4543_v14 = vpop.f32.mrf.mxu1 }
 0x9eb   :  { %v4504_v15 = vpop.f32.mrf.mxu0 }
 0x9ec   :  { %v4550_v16 = vmax.f32 %v4542_v11, 0.0  ;;  %v4544_v17 = vadd.f32 %v4543_v14, %v4503_v13  ;;  %v4545_v20 = vpop.f32.mrf.mxu1 }
 0x9ed   :  { %v4505_v21 = vpop.f32.mrf.mxu0 }
 0x9ee   :  { %v4578_v28 = vmul.f32 %v4567_v12, %v4550_v16  ;;  %v4551_v22 = vmax.f32 %v4544_v17, 0.0  ;;  %v4546_v23 = vpop.f32.mrf.mxu1 }
 0x9f0   :  { %v4579_v30 = vmul.f32 %v4571_v24, %v4551_v22  ;;  %v4581_v31 = vadd.f32 %v4580_v55, %v4578_v28 }
 0x9f2   :  { %v4582_v27 = vadd.f32 %v4581_v31, %v4579_v30 }
 0x9f4   :  { %4583 = vadd.xlane.f32.xlu0 %v4582_v27 }
 0xa7d   :  { %v4584_v33 = vpop.xlane.xlu0 %4583 }
 0xa7e   :  { %v4585_v34 = vadd.f32 %v4584_v33, %v4554_v32 }
 0xa80   :  { %4587 = vst.msk [vmem:[%s6276_s7] sm:$0xff] %vm4586_vm1, %v4585_v34 }
 0xa81   :  { %4592 = vsyncpa [#allocation3], 1 }
 0xa82   :  { %4593 = vsyncpa [#allocation5], 1 }
 0xa83   :  { %4594 = vsyncpa [#allocation8], 1 }
 0xa84   :  { %4595 = vsyncpa [#allocation11], 1 }

</bundles_post_ra>
